<compile_context>
chip_gen: v6e
topology: v6e:2x2x1
jax: 0.10.0
libtpu: 0.0.40
codegen_flags: <defaults>
</compile_context>

<pallas_src>
import jax
import jax.numpy as jnp
from jax.experimental import pallas as pl
from jax.experimental.pallas import tpu as pltpu

# ---- problem sizes (small, consistent with the module semantics) ----
B, C_IN, H, W = 2, 3, 32, 32          # input batch, NCHW
C_IN_P = 4                            # input channels zero-padded so B*C_IN_P = 8 (clean conv matmul K)
C_FEAT = 16                           # feature channels from the stand-in backbone
POOL = 4                              # pooling_kernel_size
Hf, Wf = H // POOL, W // POOL         # 8, 8
HW, HFWF = H * W, Hf * Wf             # 1024, 64
D = C_FEAT * HFWF                     # flattened feature dim = 1024
K = 64                                # PCA components (deterministic stand-in for n_comps=0.97)
R = C_FEAT * B                        # 32 slab rows, channel-major: row r = c*B + b


# --------------------------------------------------------------------------
# Single fused kernel: backbone stand-in + avg-pool + PCA + FRE + upsample
# --------------------------------------------------------------------------
def dfm_kernel(x_ref, wblk_ref, bias_ref, p_ref, mean_ref, v_ref, vt_ref, u_ref,
               amap_ref, score_ref):
    # ---- stand-in backbone: 1x1 conv for ALL (channel, batch) rows as ONE matmul, bias+ReLU ----
    feat = jnp.dot(wblk_ref[...], x_ref[...],
                   preferred_element_type=jnp.float32)                 # (R, HW) f32
    feat = jnp.maximum(feat + bias_ref[...], 0.0)

    # ---- avg_pool2d(k=4) for all rows at once: ONE bf16 MXU matmul, f32 accumulation ----
    pooled = jnp.dot(feat.astype(jnp.bfloat16), p_ref[...],
                     preferred_element_type=jnp.float32)               # (R, HFWF) f32

    # ---- PCA centering (anomalib PCA.transform centers in place, so the FRE diff is
    #      against centered features) ----
    centered = pooled - mean_ref[...]                                  # (R, HFWF) f32

    # Per-channel (B, HFWF) blocks of the centered slab (row r = c*B + b), sliced once,
    # reused by both the projection and the FRE accumulation below.
    cent_blocks = [centered[c * B:(c + 1) * B, :] for c in range(C_FEAT)]

    # ---- PCA transform: proj[b] = sum_c centered[b, c, :] @ V_c  (V kept f32 for accuracy) ----
    proj = jnp.dot(cent_blocks[0], v_ref[0:HFWF, :],
                   preferred_element_type=jnp.float32)                 # (B, K) f32
    for c in range(1, C_FEAT):
        proj = proj + jnp.dot(cent_blocks[c], v_ref[c * HFWF:(c + 1) * HFWF, :],
                              preferred_element_type=jnp.float32)

    # ---- PCA inverse transform: ONE matmul against host-pretransposed V^T (K, D) ----
    recon = jnp.dot(proj, vt_ref[...],
                    preferred_element_type=jnp.float32)                # (B, D) f32, lane-dense

    # ---- FRE: squared reconstruction error, channel-summed into the (B, HFWF) score map ----
    d0 = cent_blocks[0] - recon[:, 0:HFWF]
    sm = d0 * d0
    for c in range(1, C_FEAT):
        dchan = cent_blocks[c] - recon[:, c * HFWF:(c + 1) * HFWF]
        sm = sm + dchan * dchan                                        # (B, HFWF) f32

    # per-sample FRE score = sum over all D features = sum of the channel-summed map
    score_ref[...] = jnp.broadcast_to(jnp.sum(sm, axis=1, keepdims=True), (B, 128))

    # bilinear upsample (align_corners=False) as ONE bf16 matmul -> lane-dense (B, HW)
    amap_ref[...] = jnp.dot(sm.astype(jnp.bfloat16), u_ref[...],
                            preferred_element_type=jnp.float32)


def dfm_fused(x_flat, wblk, bias_col, pool_mat, mean_slab, v, vt, upsample_mat):
    return pl.pallas_call(
        dfm_kernel,
        out_shape=(
            jax.ShapeDtypeStruct((B, HW), jnp.float32),    # anomaly map (flattened pixels, lane-dense)
            jax.ShapeDtypeStruct((B, 128), jnp.float32),   # per-sample FRE score (lane-broadcast, sliced in wrapper)
        ),
        in_specs=[
            pl.BlockSpec(memory_space=pltpu.MemorySpace.VMEM),   # x          (B*C_IN_P, HW) f32
            pl.BlockSpec(memory_space=pltpu.MemorySpace.VMEM),   # conv Wblk  (R, B*C_IN_P) f32 block-diag
            pl.BlockSpec(memory_space=pltpu.MemorySpace.VMEM),   # conv bias  (R, 1) f32
            pl.BlockSpec(memory_space=pltpu.MemorySpace.VMEM),   # pool P     (HW, HFWF) bf16
            pl.BlockSpec(memory_space=pltpu.MemorySpace.VMEM),   # PCA mean   (R, HFWF) f32 (slab layout)
            pl.BlockSpec(memory_space=pltpu.MemorySpace.VMEM),   # PCA V      (D, K) f32
            pl.BlockSpec(memory_space=pltpu.MemorySpace.VMEM),   # PCA V^T    (K, D) f32
            pl.BlockSpec(memory_space=pltpu.MemorySpace.VMEM),   # upsample U (HFWF, HW) bf16
        ],
        out_specs=(
            pl.BlockSpec(memory_space=pltpu.MemorySpace.VMEM),
            pl.BlockSpec(memory_space=pltpu.MemorySpace.VMEM),
        ),
    )(x_flat, wblk, bias_col, pool_mat, mean_slab, v, vt, upsample_mat)


# --------------------------------------------------------------------------
# Full DFM forward (inference / eval mode, score_type="fre")
# --------------------------------------------------------------------------
@jax.jit
def dfm_forward(batch, params):
    x = jnp.pad(batch, ((0, 0), (0, C_IN_P - C_IN), (0, 0), (0, 0)))   # zero channel pad, (B, 4, H, W)
    x_flat = x.reshape(B * C_IN_P, HW)                                 # free view
    amap_flat, score_pad = dfm_fused(x_flat, params["wblk"], params["bias"], params["pool"],
                                     params["mean_slab"], params["v"], params["vt"],
                                     params["upsample"])
    anomaly_map = amap_flat.reshape(B, 1, H, W)                        # free view
    pred_score = score_pad[:, 0]                                       # (B,)
    return pred_score, anomaly_map


# --------------------------------------------------------------------------
# Constant construction (host side, once)
# --------------------------------------------------------------------------
def _interp_matrix_1d(src, dst):
    """Half-pixel (align_corners=False) bilinear interpolation weights, shape (src, dst)."""
    pos = (jnp.arange(dst, dtype=jnp.float32) + 0.5) * (src / dst) - 0.5
    lo = jnp.floor(pos)
    frac = pos - lo
    lo_i = jnp.clip(lo.astype(jnp.int32), 0, src - 1)
    hi_i = jnp.clip(lo.astype(jnp.int32) + 1, 0, src - 1)
    rows = jnp.arange(src)[:, None]
    w = ((rows == lo_i[None, :]) * (1.0 - frac)[None, :]
         + (rows == hi_i[None, :]) * frac[None, :])
    return w.astype(jnp.float32)


def make_params(key):
    k1, k2, k3, k4 = jax.random.split(key, 4)
    w = jax.random.normal(k1, (C_FEAT, C_IN), jnp.float32) * 0.1      # stand-in 1x1 conv weight
    bias = jax.random.normal(k2, (C_FEAT,), jnp.float32) * 0.1        # stand-in conv bias
    mean = jax.random.normal(k3, (D,), jnp.float32) * 0.1             # PCA mean
    v, _ = jnp.linalg.qr(jax.random.normal(k4, (D, K), jnp.float32))  # orthonormal PCA components (D, K)

    # Block-diagonal conv weight producing all (channel, batch) rows in one matmul:
    # wblk[c*B + b, b'*C_IN_P + ci] = w[c, ci] * (b == b'); padded input channel column is zero.
    w_pad = jnp.pad(w, ((0, 0), (0, C_IN_P - C_IN)))
    wblk = jnp.einsum('cf,bd->cbdf', w_pad, jnp.eye(B, dtype=jnp.float32))
    wblk = wblk.reshape(R, B * C_IN_P)

    bias_col = jnp.repeat(bias, B).reshape(R, 1)                      # row c*B+b -> bias[c]

    # PCA mean tiled into the channel-major slab layout (row r = c*B + b).
    mean_slab = jnp.repeat(mean.reshape(C_FEAT, HFWF), B, axis=0)     # (R, HFWF)

    # avg_pool2d(kernel=4) as a (HW, HFWF) matrix (separable -> kron); 1/16 entries exact in bf16.
    py = (jnp.arange(H)[:, None] // POOL == jnp.arange(Hf)[None, :]).astype(jnp.float32) / POOL
    px = (jnp.arange(W)[:, None] // POOL == jnp.arange(Wf)[None, :]).astype(jnp.float32) / POOL
    pool_mat = jnp.kron(py, px)                                       # (HW, HFWF)

    # bilinear upsample (Hf,Wf)->(H,W), align_corners=False, as a (HFWF, HW) matrix; exact in bf16.
    uy = _interp_matrix_1d(Hf, H)                                     # (Hf, H)
    ux = _interp_matrix_1d(Wf, W)                                     # (Wf, W)
    upsample_mat = jnp.kron(uy, ux)                                   # (HFWF, HW)

    return {
        "wblk": wblk,                                  # (R, 8) f32
        "bias": bias_col,                              # (R, 1) f32
        "mean_slab": mean_slab,                        # (R, HFWF) f32
        "v": v,                                        # (D, K) f32  (kept f32: FRE residual accuracy)
        "vt": jnp.asarray(v.T),                        # (K, D) f32  (pre-transposed, no in-kernel transpose)
        "pool": pool_mat.astype(jnp.bfloat16),         # (HW, HFWF) bf16, exact
        "upsample": upsample_mat.astype(jnp.bfloat16), # (HFWF, HW) bf16, exact
    }


if __name__ == "__main__":
    key = jax.random.PRNGKey(0)
    kp, kx = jax.random.split(key)

    params = make_params(kp)
    batch = jax.random.normal(kx, (B, C_IN, H, W), jnp.float32)       # deterministic NCHW input

    pred_score, anomaly_map = dfm_forward(batch, params)
    jax.block_until_ready(pred_score)
    jax.block_until_ready(anomaly_map)

    assert pred_score.shape == (B,)
    assert anomaly_map.shape == (B, 1, H, W)
    assert bool(jnp.all(jnp.isfinite(pred_score)))
    assert bool(jnp.all(jnp.isfinite(anomaly_map)))
    print("KERNEL_OK")
</pallas_src>

<mosaic_0001>
module attributes {stable_mosaic.version = 11 : i64} {
  func.func @dfm_kernel(%arg0: memref<8x1024xf32, #tpu.memory_space<vmem>>, %arg1: memref<32x8xf32, #tpu.memory_space<vmem>>, %arg2: memref<32x1xf32, #tpu.memory_space<vmem>>, %arg3: memref<1024x64xbf16, #tpu.memory_space<vmem>>, %arg4: memref<32x64xf32, #tpu.memory_space<vmem>>, %arg5: memref<1024x64xf32, #tpu.memory_space<vmem>>, %arg6: memref<64x1024xf32, #tpu.memory_space<vmem>>, %arg7: memref<64x1024xbf16, #tpu.memory_space<vmem>>, %arg8: memref<2x1024xf32, #tpu.memory_space<vmem>>, %arg9: memref<2x128xf32, #tpu.memory_space<vmem>>) attributes {dimension_semantics = [], scalar_prefetch = 0 : i64, scratch_operands = 0 : i64, tpu.core_type = #tpu.core_type<tc>} {
    %c0 = arith.constant 0 : index
    %c0_0 = arith.constant 0 : index
    %0 = vector.load %arg1[%c0, %c0_0] : memref<32x8xf32, #tpu.memory_space<vmem>>, vector<32x8xf32>
    %c0_1 = arith.constant 0 : index
    %c0_2 = arith.constant 0 : index
    %1 = vector.load %arg0[%c0_1, %c0_2] : memref<8x1024xf32, #tpu.memory_space<vmem>>, vector<8x1024xf32>
    %cst = arith.constant dense<0.000000e+00> : vector<32x1024xf32>
    %2 = tpu.matmul %0, %1, %cst {dimension_numbers = #tpu.dot_dimension_numbers<[1], [0], [0], [1], [0, 0, 1, 1], [], []>} : vector<32x8xf32>, vector<8x1024xf32>, vector<32x1024xf32> -> vector<32x1024xf32>
    %c0_3 = arith.constant 0 : index
    %c0_4 = arith.constant 0 : index
    %3 = vector.load %arg2[%c0_3, %c0_4] : memref<32x1xf32, #tpu.memory_space<vmem>>, vector<32x1xf32>
    %4 = vector.broadcast %3 : vector<32x1xf32> to vector<32x1024xf32>
    %5 = arith.addf %2, %4 : vector<32x1024xf32>
    %cst_5 = arith.constant 0.000000e+00 : f32
    %6 = vector.broadcast %cst_5 : f32 to vector<32x1024xf32>
    %7 = arith.maximumf %5, %6 : vector<32x1024xf32>
    %8 = arith.truncf %7 : vector<32x1024xf32> to vector<32x1024xbf16>
    %c0_6 = arith.constant 0 : index
    %c0_7 = arith.constant 0 : index
    %9 = vector.load %arg3[%c0_6, %c0_7] : memref<1024x64xbf16, #tpu.memory_space<vmem>>, vector<1024x64xbf16>
    %cst_8 = arith.constant dense<0.000000e+00> : vector<32x64xf32>
    %10 = tpu.matmul %8, %9, %cst_8 {dimension_numbers = #tpu.dot_dimension_numbers<[1], [0], [0], [1], [0, 0, 1, 1], [], []>} : vector<32x1024xbf16>, vector<1024x64xbf16>, vector<32x64xf32> -> vector<32x64xf32>
    %c0_9 = arith.constant 0 : index
    %c0_10 = arith.constant 0 : index
    %11 = vector.load %arg4[%c0_9, %c0_10] : memref<32x64xf32, #tpu.memory_space<vmem>>, vector<32x64xf32>
    %12 = arith.subf %10, %11 : vector<32x64xf32>
    %13 = vector.extract_strided_slice %12 {offsets = [0, 0], sizes = [2, 64], strides = [1, 1]} : vector<32x64xf32> to vector<2x64xf32>
    %14 = vector.extract_strided_slice %12 {offsets = [2, 0], sizes = [2, 64], strides = [1, 1]} : vector<32x64xf32> to vector<2x64xf32>
    %15 = vector.extract_strided_slice %12 {offsets = [4, 0], sizes = [2, 64], strides = [1, 1]} : vector<32x64xf32> to vector<2x64xf32>
    %16 = vector.extract_strided_slice %12 {offsets = [6, 0], sizes = [2, 64], strides = [1, 1]} : vector<32x64xf32> to vector<2x64xf32>
    %17 = vector.extract_strided_slice %12 {offsets = [8, 0], sizes = [2, 64], strides = [1, 1]} : vector<32x64xf32> to vector<2x64xf32>
    %18 = vector.extract_strided_slice %12 {offsets = [10, 0], sizes = [2, 64], strides = [1, 1]} : vector<32x64xf32> to vector<2x64xf32>
    %19 = vector.extract_strided_slice %12 {offsets = [12, 0], sizes = [2, 64], strides = [1, 1]} : vector<32x64xf32> to vector<2x64xf32>
    %20 = vector.extract_strided_slice %12 {offsets = [14, 0], sizes = [2, 64], strides = [1, 1]} : vector<32x64xf32> to vector<2x64xf32>
    %21 = vector.extract_strided_slice %12 {offsets = [16, 0], sizes = [2, 64], strides = [1, 1]} : vector<32x64xf32> to vector<2x64xf32>
    %22 = vector.extract_strided_slice %12 {offsets = [18, 0], sizes = [2, 64], strides = [1, 1]} : vector<32x64xf32> to vector<2x64xf32>
    %23 = vector.extract_strided_slice %12 {offsets = [20, 0], sizes = [2, 64], strides = [1, 1]} : vector<32x64xf32> to vector<2x64xf32>
    %24 = vector.extract_strided_slice %12 {offsets = [22, 0], sizes = [2, 64], strides = [1, 1]} : vector<32x64xf32> to vector<2x64xf32>
    %25 = vector.extract_strided_slice %12 {offsets = [24, 0], sizes = [2, 64], strides = [1, 1]} : vector<32x64xf32> to vector<2x64xf32>
    %26 = vector.extract_strided_slice %12 {offsets = [26, 0], sizes = [2, 64], strides = [1, 1]} : vector<32x64xf32> to vector<2x64xf32>
    %27 = vector.extract_strided_slice %12 {offsets = [28, 0], sizes = [2, 64], strides = [1, 1]} : vector<32x64xf32> to vector<2x64xf32>
    %28 = vector.extract_strided_slice %12 {offsets = [30, 0], sizes = [2, 64], strides = [1, 1]} : vector<32x64xf32> to vector<2x64xf32>
    %c0_11 = arith.constant 0 : index
    %c0_12 = arith.constant 0 : index
    %29 = vector.load %arg5[%c0_11, %c0_12] : memref<1024x64xf32, #tpu.memory_space<vmem>>, vector<64x64xf32>
    %cst_13 = arith.constant dense<0.000000e+00> : vector<2x64xf32>
    %30 = tpu.matmul %13, %29, %cst_13 {dimension_numbers = #tpu.dot_dimension_numbers<[1], [0], [0], [1], [0, 0, 1, 1], [], []>} : vector<2x64xf32>, vector<64x64xf32>, vector<2x64xf32> -> vector<2x64xf32>
    %c64 = arith.constant 64 : index
    %c0_14 = arith.constant 0 : index
    %31 = vector.load %arg5[%c64, %c0_14] : memref<1024x64xf32, #tpu.memory_space<vmem>>, vector<64x64xf32>
    %cst_15 = arith.constant dense<0.000000e+00> : vector<2x64xf32>
    %32 = tpu.matmul %14, %31, %cst_15 {dimension_numbers = #tpu.dot_dimension_numbers<[1], [0], [0], [1], [0, 0, 1, 1], [], []>} : vector<2x64xf32>, vector<64x64xf32>, vector<2x64xf32> -> vector<2x64xf32>
    %33 = arith.addf %30, %32 : vector<2x64xf32>
    %c128 = arith.constant 128 : index
    %c0_16 = arith.constant 0 : index
    %34 = vector.load %arg5[%c128, %c0_16] : memref<1024x64xf32, #tpu.memory_space<vmem>>, vector<64x64xf32>
    %cst_17 = arith.constant dense<0.000000e+00> : vector<2x64xf32>
    %35 = tpu.matmul %15, %34, %cst_17 {dimension_numbers = #tpu.dot_dimension_numbers<[1], [0], [0], [1], [0, 0, 1, 1], [], []>} : vector<2x64xf32>, vector<64x64xf32>, vector<2x64xf32> -> vector<2x64xf32>
    %36 = arith.addf %33, %35 : vector<2x64xf32>
    %c192 = arith.constant 192 : index
    %c0_18 = arith.constant 0 : index
    %37 = vector.load %arg5[%c192, %c0_18] : memref<1024x64xf32, #tpu.memory_space<vmem>>, vector<64x64xf32>
    %cst_19 = arith.constant dense<0.000000e+00> : vector<2x64xf32>
    %38 = tpu.matmul %16, %37, %cst_19 {dimension_numbers = #tpu.dot_dimension_numbers<[1], [0], [0], [1], [0, 0, 1, 1], [], []>} : vector<2x64xf32>, vector<64x64xf32>, vector<2x64xf32> -> vector<2x64xf32>
    %39 = arith.addf %36, %38 : vector<2x64xf32>
    %c256 = arith.constant 256 : index
    %c0_20 = arith.constant 0 : index
    %40 = vector.load %arg5[%c256, %c0_20] : memref<1024x64xf32, #tpu.memory_space<vmem>>, vector<64x64xf32>
    %cst_21 = arith.constant dense<0.000000e+00> : vector<2x64xf32>
    %41 = tpu.matmul %17, %40, %cst_21 {dimension_numbers = #tpu.dot_dimension_numbers<[1], [0], [0], [1], [0, 0, 1, 1], [], []>} : vector<2x64xf32>, vector<64x64xf32>, vector<2x64xf32> -> vector<2x64xf32>
    %42 = arith.addf %39, %41 : vector<2x64xf32>
    %c320 = arith.constant 320 : index
    %c0_22 = arith.constant 0 : index
    %43 = vector.load %arg5[%c320, %c0_22] : memref<1024x64xf32, #tpu.memory_space<vmem>>, vector<64x64xf32>
    %cst_23 = arith.constant dense<0.000000e+00> : vector<2x64xf32>
    %44 = tpu.matmul %18, %43, %cst_23 {dimension_numbers = #tpu.dot_dimension_numbers<[1], [0], [0], [1], [0, 0, 1, 1], [], []>} : vector<2x64xf32>, vector<64x64xf32>, vector<2x64xf32> -> vector<2x64xf32>
    %45 = arith.addf %42, %44 : vector<2x64xf32>
    %c384 = arith.constant 384 : index
    %c0_24 = arith.constant 0 : index
    %46 = vector.load %arg5[%c384, %c0_24] : memref<1024x64xf32, #tpu.memory_space<vmem>>, vector<64x64xf32>
    %cst_25 = arith.constant dense<0.000000e+00> : vector<2x64xf32>
    %47 = tpu.matmul %19, %46, %cst_25 {dimension_numbers = #tpu.dot_dimension_numbers<[1], [0], [0], [1], [0, 0, 1, 1], [], []>} : vector<2x64xf32>, vector<64x64xf32>, vector<2x64xf32> -> vector<2x64xf32>
    %48 = arith.addf %45, %47 : vector<2x64xf32>
    %c448 = arith.constant 448 : index
    %c0_26 = arith.constant 0 : index
    %49 = vector.load %arg5[%c448, %c0_26] : memref<1024x64xf32, #tpu.memory_space<vmem>>, vector<64x64xf32>
    %cst_27 = arith.constant dense<0.000000e+00> : vector<2x64xf32>
    %50 = tpu.matmul %20, %49, %cst_27 {dimension_numbers = #tpu.dot_dimension_numbers<[1], [0], [0], [1], [0, 0, 1, 1], [], []>} : vector<2x64xf32>, vector<64x64xf32>, vector<2x64xf32> -> vector<2x64xf32>
    %51 = arith.addf %48, %50 : vector<2x64xf32>
    %c512 = arith.constant 512 : index
    %c0_28 = arith.constant 0 : index
    %52 = vector.load %arg5[%c512, %c0_28] : memref<1024x64xf32, #tpu.memory_space<vmem>>, vector<64x64xf32>
    %cst_29 = arith.constant dense<0.000000e+00> : vector<2x64xf32>
    %53 = tpu.matmul %21, %52, %cst_29 {dimension_numbers = #tpu.dot_dimension_numbers<[1], [0], [0], [1], [0, 0, 1, 1], [], []>} : vector<2x64xf32>, vector<64x64xf32>, vector<2x64xf32> -> vector<2x64xf32>
    %54 = arith.addf %51, %53 : vector<2x64xf32>
    %c576 = arith.constant 576 : index
    %c0_30 = arith.constant 0 : index
    %55 = vector.load %arg5[%c576, %c0_30] : memref<1024x64xf32, #tpu.memory_space<vmem>>, vector<64x64xf32>
    %cst_31 = arith.constant dense<0.000000e+00> : vector<2x64xf32>
    %56 = tpu.matmul %22, %55, %cst_31 {dimension_numbers = #tpu.dot_dimension_numbers<[1], [0], [0], [1], [0, 0, 1, 1], [], []>} : vector<2x64xf32>, vector<64x64xf32>, vector<2x64xf32> -> vector<2x64xf32>
    %57 = arith.addf %54, %56 : vector<2x64xf32>
    %c640 = arith.constant 640 : index
    %c0_32 = arith.constant 0 : index
    %58 = vector.load %arg5[%c640, %c0_32] : memref<1024x64xf32, #tpu.memory_space<vmem>>, vector<64x64xf32>
    %cst_33 = arith.constant dense<0.000000e+00> : vector<2x64xf32>
    %59 = tpu.matmul %23, %58, %cst_33 {dimension_numbers = #tpu.dot_dimension_numbers<[1], [0], [0], [1], [0, 0, 1, 1], [], []>} : vector<2x64xf32>, vector<64x64xf32>, vector<2x64xf32> -> vector<2x64xf32>
    %60 = arith.addf %57, %59 : vector<2x64xf32>
    %c704 = arith.constant 704 : index
    %c0_34 = arith.constant 0 : index
    %61 = vector.load %arg5[%c704, %c0_34] : memref<1024x64xf32, #tpu.memory_space<vmem>>, vector<64x64xf32>
    %cst_35 = arith.constant dense<0.000000e+00> : vector<2x64xf32>
    %62 = tpu.matmul %24, %61, %cst_35 {dimension_numbers = #tpu.dot_dimension_numbers<[1], [0], [0], [1], [0, 0, 1, 1], [], []>} : vector<2x64xf32>, vector<64x64xf32>, vector<2x64xf32> -> vector<2x64xf32>
    %63 = arith.addf %60, %62 : vector<2x64xf32>
    %c768 = arith.constant 768 : index
    %c0_36 = arith.constant 0 : index
    %64 = vector.load %arg5[%c768, %c0_36] : memref<1024x64xf32, #tpu.memory_space<vmem>>, vector<64x64xf32>
    %cst_37 = arith.constant dense<0.000000e+00> : vector<2x64xf32>
    %65 = tpu.matmul %25, %64, %cst_37 {dimension_numbers = #tpu.dot_dimension_numbers<[1], [0], [0], [1], [0, 0, 1, 1], [], []>} : vector<2x64xf32>, vector<64x64xf32>, vector<2x64xf32> -> vector<2x64xf32>
    %66 = arith.addf %63, %65 : vector<2x64xf32>
    %c832 = arith.constant 832 : index
    %c0_38 = arith.constant 0 : index
    %67 = vector.load %arg5[%c832, %c0_38] : memref<1024x64xf32, #tpu.memory_space<vmem>>, vector<64x64xf32>
    %cst_39 = arith.constant dense<0.000000e+00> : vector<2x64xf32>
    %68 = tpu.matmul %26, %67, %cst_39 {dimension_numbers = #tpu.dot_dimension_numbers<[1], [0], [0], [1], [0, 0, 1, 1], [], []>} : vector<2x64xf32>, vector<64x64xf32>, vector<2x64xf32> -> vector<2x64xf32>
    %69 = arith.addf %66, %68 : vector<2x64xf32>
    %c896 = arith.constant 896 : index
    %c0_40 = arith.constant 0 : index
    %70 = vector.load %arg5[%c896, %c0_40] : memref<1024x64xf32, #tpu.memory_space<vmem>>, vector<64x64xf32>
    %cst_41 = arith.constant dense<0.000000e+00> : vector<2x64xf32>
    %71 = tpu.matmul %27, %70, %cst_41 {dimension_numbers = #tpu.dot_dimension_numbers<[1], [0], [0], [1], [0, 0, 1, 1], [], []>} : vector<2x64xf32>, vector<64x64xf32>, vector<2x64xf32> -> vector<2x64xf32>
    %72 = arith.addf %69, %71 : vector<2x64xf32>
    %c960 = arith.constant 960 : index
    %c0_42 = arith.constant 0 : index
    %73 = vector.load %arg5[%c960, %c0_42] : memref<1024x64xf32, #tpu.memory_space<vmem>>, vector<64x64xf32>
    %cst_43 = arith.constant dense<0.000000e+00> : vector<2x64xf32>
    %74 = tpu.matmul %28, %73, %cst_43 {dimension_numbers = #tpu.dot_dimension_numbers<[1], [0], [0], [1], [0, 0, 1, 1], [], []>} : vector<2x64xf32>, vector<64x64xf32>, vector<2x64xf32> -> vector<2x64xf32>
    %75 = arith.addf %72, %74 : vector<2x64xf32>
    %c0_44 = arith.constant 0 : index
    %c0_45 = arith.constant 0 : index
    %76 = vector.load %arg6[%c0_44, %c0_45] : memref<64x1024xf32, #tpu.memory_space<vmem>>, vector<64x1024xf32>
    %cst_46 = arith.constant dense<0.000000e+00> : vector<2x1024xf32>
    %77 = tpu.matmul %75, %76, %cst_46 {dimension_numbers = #tpu.dot_dimension_numbers<[1], [0], [0], [1], [0, 0, 1, 1], [], []>} : vector<2x64xf32>, vector<64x1024xf32>, vector<2x1024xf32> -> vector<2x1024xf32>
    %78 = vector.extract_strided_slice %77 {offsets = [0, 0], sizes = [2, 64], strides = [1, 1]} : vector<2x1024xf32> to vector<2x64xf32>
    %79 = arith.subf %13, %78 : vector<2x64xf32>
    %80 = arith.mulf %79, %79 : vector<2x64xf32>
    %81 = vector.extract_strided_slice %77 {offsets = [0, 64], sizes = [2, 64], strides = [1, 1]} : vector<2x1024xf32> to vector<2x64xf32>
    %82 = arith.subf %14, %81 : vector<2x64xf32>
    %83 = arith.mulf %82, %82 : vector<2x64xf32>
    %84 = arith.addf %80, %83 : vector<2x64xf32>
    %85 = vector.extract_strided_slice %77 {offsets = [0, 128], sizes = [2, 64], strides = [1, 1]} : vector<2x1024xf32> to vector<2x64xf32>
    %86 = arith.subf %15, %85 : vector<2x64xf32>
    %87 = arith.mulf %86, %86 : vector<2x64xf32>
    %88 = arith.addf %84, %87 : vector<2x64xf32>
    %89 = vector.extract_strided_slice %77 {offsets = [0, 192], sizes = [2, 64], strides = [1, 1]} : vector<2x1024xf32> to vector<2x64xf32>
    %90 = arith.subf %16, %89 : vector<2x64xf32>
    %91 = arith.mulf %90, %90 : vector<2x64xf32>
    %92 = arith.addf %88, %91 : vector<2x64xf32>
    %93 = vector.extract_strided_slice %77 {offsets = [0, 256], sizes = [2, 64], strides = [1, 1]} : vector<2x1024xf32> to vector<2x64xf32>
    %94 = arith.subf %17, %93 : vector<2x64xf32>
    %95 = arith.mulf %94, %94 : vector<2x64xf32>
    %96 = arith.addf %92, %95 : vector<2x64xf32>
    %97 = vector.extract_strided_slice %77 {offsets = [0, 320], sizes = [2, 64], strides = [1, 1]} : vector<2x1024xf32> to vector<2x64xf32>
    %98 = arith.subf %18, %97 : vector<2x64xf32>
    %99 = arith.mulf %98, %98 : vector<2x64xf32>
    %100 = arith.addf %96, %99 : vector<2x64xf32>
    %101 = vector.extract_strided_slice %77 {offsets = [0, 384], sizes = [2, 64], strides = [1, 1]} : vector<2x1024xf32> to vector<2x64xf32>
    %102 = arith.subf %19, %101 : vector<2x64xf32>
    %103 = arith.mulf %102, %102 : vector<2x64xf32>
    %104 = arith.addf %100, %103 : vector<2x64xf32>
    %105 = vector.extract_strided_slice %77 {offsets = [0, 448], sizes = [2, 64], strides = [1, 1]} : vector<2x1024xf32> to vector<2x64xf32>
    %106 = arith.subf %20, %105 : vector<2x64xf32>
    %107 = arith.mulf %106, %106 : vector<2x64xf32>
    %108 = arith.addf %104, %107 : vector<2x64xf32>
    %109 = vector.extract_strided_slice %77 {offsets = [0, 512], sizes = [2, 64], strides = [1, 1]} : vector<2x1024xf32> to vector<2x64xf32>
    %110 = arith.subf %21, %109 : vector<2x64xf32>
    %111 = arith.mulf %110, %110 : vector<2x64xf32>
    %112 = arith.addf %108, %111 : vector<2x64xf32>
    %113 = vector.extract_strided_slice %77 {offsets = [0, 576], sizes = [2, 64], strides = [1, 1]} : vector<2x1024xf32> to vector<2x64xf32>
    %114 = arith.subf %22, %113 : vector<2x64xf32>
    %115 = arith.mulf %114, %114 : vector<2x64xf32>
    %116 = arith.addf %112, %115 : vector<2x64xf32>
    %117 = vector.extract_strided_slice %77 {offsets = [0, 640], sizes = [2, 64], strides = [1, 1]} : vector<2x1024xf32> to vector<2x64xf32>
    %118 = arith.subf %23, %117 : vector<2x64xf32>
    %119 = arith.mulf %118, %118 : vector<2x64xf32>
    %120 = arith.addf %116, %119 : vector<2x64xf32>
    %121 = vector.extract_strided_slice %77 {offsets = [0, 704], sizes = [2, 64], strides = [1, 1]} : vector<2x1024xf32> to vector<2x64xf32>
    %122 = arith.subf %24, %121 : vector<2x64xf32>
    %123 = arith.mulf %122, %122 : vector<2x64xf32>
    %124 = arith.addf %120, %123 : vector<2x64xf32>
    %125 = vector.extract_strided_slice %77 {offsets = [0, 768], sizes = [2, 64], strides = [1, 1]} : vector<2x1024xf32> to vector<2x64xf32>
    %126 = arith.subf %25, %125 : vector<2x64xf32>
    %127 = arith.mulf %126, %126 : vector<2x64xf32>
    %128 = arith.addf %124, %127 : vector<2x64xf32>
    %129 = vector.extract_strided_slice %77 {offsets = [0, 832], sizes = [2, 64], strides = [1, 1]} : vector<2x1024xf32> to vector<2x64xf32>
    %130 = arith.subf %26, %129 : vector<2x64xf32>
    %131 = arith.mulf %130, %130 : vector<2x64xf32>
    %132 = arith.addf %128, %131 : vector<2x64xf32>
    %133 = vector.extract_strided_slice %77 {offsets = [0, 896], sizes = [2, 64], strides = [1, 1]} : vector<2x1024xf32> to vector<2x64xf32>
    %134 = arith.subf %27, %133 : vector<2x64xf32>
    %135 = arith.mulf %134, %134 : vector<2x64xf32>
    %136 = arith.addf %132, %135 : vector<2x64xf32>
    %137 = vector.extract_strided_slice %77 {offsets = [0, 960], sizes = [2, 64], strides = [1, 1]} : vector<2x1024xf32> to vector<2x64xf32>
    %138 = arith.subf %28, %137 : vector<2x64xf32>
    %139 = arith.mulf %138, %138 : vector<2x64xf32>
    %140 = arith.addf %136, %139 : vector<2x64xf32>
    %cst_47 = arith.constant dense<0.000000e+00> : vector<2xf32>
    %141 = vector.multi_reduction <add>, %140, %cst_47 [1] : vector<2x64xf32> to vector<2xf32>
    %142 = vector.shape_cast %141 : vector<2xf32> to vector<2x1xf32>
    %143 = vector.shape_cast %142 : vector<2x1xf32> to vector<2x1xf32>
    %144 = vector.broadcast %143 : vector<2x1xf32> to vector<2x128xf32>
    %c0_48 = arith.constant 0 : index
    %c0_49 = arith.constant 0 : index
    %145 = vector.load %arg9[%c0_48, %c0_49] : memref<2x128xf32, #tpu.memory_space<vmem>>, vector<2x128xf32>
    tpu.vector_store %arg9[%c0_48, %c0_49], %144 {strides = array<i32>} : memref<2x128xf32, #tpu.memory_space<vmem>>, vector<2x128xf32>,
    %146 = arith.truncf %140 : vector<2x64xf32> to vector<2x64xbf16>
    %c0_50 = arith.constant 0 : index
    %c0_51 = arith.constant 0 : index
    %147 = vector.load %arg7[%c0_50, %c0_51] : memref<64x1024xbf16, #tpu.memory_space<vmem>>, vector<64x1024xbf16>
    %cst_52 = arith.constant dense<0.000000e+00> : vector<2x1024xf32>
    %148 = tpu.matmul %146, %147, %cst_52 {dimension_numbers = #tpu.dot_dimension_numbers<[1], [0], [0], [1], [0, 0, 1, 1], [], []>} : vector<2x64xbf16>, vector<64x1024xbf16>, vector<2x1024xf32> -> vector<2x1024xf32>
    %c0_53 = arith.constant 0 : index
    %c0_54 = arith.constant 0 : index
    %149 = vector.load %arg8[%c0_53, %c0_54] : memref<2x1024xf32, #tpu.memory_space<vmem>>, vector<2x1024xf32>
    tpu.vector_store %arg8[%c0_53, %c0_54], %148 {strides = array<i32>} : memref<2x1024xf32, #tpu.memory_space<vmem>>, vector<2x1024xf32>,
    return
  }
}

</mosaic_0001>

<bundles_post_ra>
// kernel: dfm_forward.1
= control target key start
LH: loop header
LB: loop body
LE: loop exit
PB: predicated region body
PF: predicated region fallthrough
CT: control target
= control target key end

     0   :  { %v4180_v3 = vmov 0.0   ;;  %vm68_vm0 = vcmask 64512   ;;  %v4181_v15 = vmov 0   ;;  %vm4182_vm1 = vmmov 0   ;;  %s5581_s0 = inlined_call_operand.vmem [shape: f32[8,1024], index: 0, kind: input, shape index: {}]   ;;  %s5582_s1 = inlined_call_operand.vmem [shape: f32[32,8], index: 1, kind: input, shape index: {}]   ;;  %s5583_s2 = inlined_call_operand.vmem [shape: f32[32,1], index: 2, kind: input, shape index: {}]   ;;  %s5584_s3 = inlined_call_operand.vmem [shape: bf16[1024,64], index: 3, kind: input, shape index: {}]   ;;  %s5585_s5 = inlined_call_operand.vmem [shape: f32[1024,64], index: 5, kind: input, shape index: {}]   ;;  %s5586_s4 = inlined_call_operand.vmem [shape: f32[32,64], index: 4, kind: input, shape index: {}]   ;;  %s5587_s6 = inlined_call_operand.vmem [shape: f32[64,1024], index: 6, kind: input, shape index: {}]   ;;  %s5588_s7 = inlined_call_operand.vmem [shape: bf16[64,1024], index: 7, kind: input, shape index: {}]   ;;  %s5589_s9 = inlined_call_operand.vmem [shape: f32[2,128], index: 9, kind: output, shape index: {1}]   ;;  %s5590_s8 = inlined_call_operand.vmem [shape: f32[2,1024], index: 8, kind: output, shape index: {0}]  }
   0x1   :  { %v37_v0 = vld [vmem:[%s5581_s0 + $0x8] sm:$0xff]  ;;  %v39_v1 = vld [vmem:[%s5581_s0 + $0x18] sm:$0xff]  ;;  %v36_v2 = vld [vmem:[%s5581_s0] sm:$0xff]  ;;  %145 = vmatprep.mubr.f32.mxu0 %v4180_v3  ;;  %234 = vmatprep.mubr.f32.mxu1 %v4180_v3  ;;  %vm1219_vm2 = vcmask 523264   ;;  %vm2994_vm3 = vcmask 517120  }
   0x2   :  { %111 = vmatprep.subr.mxu0 %v37_v0  ;;  %200 = vmatprep.subr.mxu1 %v39_v1  ;;  %v38_v4 = vld [vmem:[%s5581_s0 + $0x10] sm:$0xff]  ;;  %v32_v5 = vld [vmem:[%s5582_s1] sm:$0xff]  ;;  %v41_v6 = vld [vmem:[%s5581_s0 + $0x28] sm:$0xff] }
   0x3   :  { %112 = vmatpush1.msra.mxu0 %v36_v2  ;;  %201 = vmatpush1.msra.mxu1 %v38_v4  ;;  %v43_v7 = vld [vmem:[%s5581_s0 + $0x38] sm:$0xff]  ;;  %v40_v8 = vld [vmem:[%s5581_s0 + $0x20] sm:$0xff]  ;;  %v42_v9 = vld [vmem:[%s5581_s0 + $0x30] sm:$0xff] }
   0x4   :  { %3413 = vmatmul.mubr.msk.f32.vlgmr.msra.gmra.mxu0 %vm68_vm0, %v32_v5  ;;  %3417 = vmatmul.mubr.msk.f32.vlgmr.msra.gmra.mxu1 %vm68_vm0, %v32_v5  ;;  %v33_v10 = vld [vmem:[%s5582_s1 + $0x8] sm:$0xff]  ;;  %v34_v11 = vld [vmem:[%s5582_s1 + $0x10] sm:$0xff]  ;;  %v44_v12 = vld [vmem:[%s5583_s2] sm:$0xff] }
   0x5   :  { %151 = vmatprep.mubr.f32.mxu0 %v4180_v3  ;;  %240 = vmatprep.mubr.f32.mxu1 %v4180_v3  ;;  %v46_v13 = vld [vmem:[%s5583_s2 + $0x10] sm:$0xff]  ;;  %v4116_v14 = vld [vmem:[%s5584_s3 + $0x78] sm:$0xff]   ;;  %v45_v17 = vld [vmem:[%s5583_s2 + $0x8] sm:$0xff] }
   0x6   :  { %289 = vmatprep.subr.mxu0 %v41_v6  ;;  %378 = vmatprep.subr.mxu1 %v43_v7  ;;  %v4117_v16 = vld [vmem:[%s5584_s3 + $0xf8] sm:$0xff]   ;;  %v4120_v22 = vld [vmem:[%s5584_s3 + $0x70] sm:$0xff]   ;;  %v4124_v26 = vld [vmem:[%s5584_s3 + $0x68] sm:$0xff]  }
   0x7   :  { %290 = vmatpush1.msra.mxu0 %v40_v8  ;;  %379 = vmatpush1.msra.mxu1 %v42_v9  ;;  %v47_v18 = vld [vmem:[%s5583_s2 + $0x18] sm:$0xff]  ;;  %v4121_v23 = vld [vmem:[%s5584_s3 + $0xf0] sm:$0xff]   ;;  %v4125_v27 = vld [vmem:[%s5584_s3 + $0xe8] sm:$0xff]  }
   0x8   :  { %3414 = vmatmul.mubr.msk.f32.gmra.mxu0 %vm68_vm0, %v33_v10  ;;  %3418 = vmatmul.mubr.msk.f32.gmra.mxu1 %vm68_vm0, %v33_v10  ;;  %v35_v19 = vld [vmem:[%s5582_s1 + $0x18] sm:$0xff]  ;;  %v4122_v24 = vld [vmem:[%s5584_s3 + $0x30] sm:$0xff]   ;;  %v4126_v28 = vld [vmem:[%s5584_s3 + $0x28] sm:$0xff]  }
   0x9   :  { %157 = vmatprep.mubr.f32.mxu0 %v4180_v3  ;;  %246 = vmatprep.mubr.f32.mxu1 %v4180_v3  ;;  %v4118_v20 = vld [vmem:[%s5584_s3 + $0x38] sm:$0xff]   ;;  %v4123_v25 = vld [vmem:[%s5584_s3 + $0xb0] sm:$0xff]   ;;  %v4127_v29 = vld [vmem:[%s5584_s3 + $0xa8] sm:$0xff]  }
   0xa   :  { %4114 = vset.pattern.permute.xlu0 %v4181_v15  ;;  %4115 = vset.pattern.permute.xlu1 %v4181_v15  ;;  %v4119_v21 = vld [vmem:[%s5584_s3 + $0xb8] sm:$0xff]   ;;  %v4128_v30 = vld [vmem:[%s5584_s3 + $0x60] sm:$0xff]   ;;  %v4136_v38 = vld [vmem:[%s5584_s3 + $0x50] sm:$0xff]  }
   0xb   :  { %50 = vperm.xlu0 %4114, %v44_v12   ;;  %60 = vperm.xlu1 %4115, %v46_v13   ;;  %v4129_v31 = vld [vmem:[%s5584_s3 + $0xe0] sm:$0xff]   ;;  %v4132_v34 = vld [vmem:[%s5584_s3 + $0x58] sm:$0xff]   ;;  %v4137_v39 = vld [vmem:[%s5584_s3 + $0xd0] sm:$0xff]  }
   0xc   :  { %3415 = vmatmul.mubr.msk.f32.gmra.mxu0 %vm68_vm0, %v34_v11  ;;  %3419 = vmatmul.mubr.msk.f32.gmra.mxu1 %vm68_vm0, %v34_v11  ;;  %v4130_v32 = vld [vmem:[%s5584_s3 + $0x20] sm:$0xff]   ;;  %v4133_v35 = vld [vmem:[%s5584_s3 + $0xd8] sm:$0xff]   ;;  %v4138_v40 = vld [vmem:[%s5584_s3 + $0x10] sm:$0xff]  }
   0xd   :  { %163 = vmatprep.mubr.f32.mxu0 %v4180_v3  ;;  %252 = vmatprep.mubr.f32.mxu1 %v4180_v3  ;;  %v4131_v33 = vld [vmem:[%s5584_s3 + $0xa0] sm:$0xff]   ;;  %v4134_v36 = vld [vmem:[%s5584_s3 + $0x18] sm:$0xff]   ;;  %v4139_v41 = vld [vmem:[%s5584_s3 + $0x90] sm:$0xff]  }
   0xe   :  { %3549 = vmatprep.subr.bf16.mxu0 %v4116_v14  ;;  %3577 = vmatprep.subr.bf16.mxu1 %v4117_v16  ;;  %v4135_v37 = vld [vmem:[%s5584_s3 + $0x98] sm:$0xff]   ;;  %v4140_v42 = vld [vmem:[%s5584_s3 + $0x48] sm:$0xff]   ;;  %v4144_v46 = vld [vmem:[%s5584_s3 + $0x40] sm:$0xff]  }
   0xf   :  { %55 = vperm.xlu0 %4114, %v45_v17   ;;  %65 = vperm.xlu1 %4115, %v47_v18   ;;  %v4141_v43 = vld [vmem:[%s5584_s3 + $0xc8] sm:$0xff]   ;;  %v4145_v47 = vld [vmem:[%s5584_s3 + $0xc0] sm:$0xff]   ;;  %v4148_v50 = vld [vmem:[%s5584_s3 + $0x178] sm:$0xff]  }
  0x10   :  { %3416 = vmatmul.mubr.msk.f32.gmra.mxu0 %vm68_vm0, %v35_v19  ;;  %3420 = vmatmul.mubr.msk.f32.gmra.mxu1 %vm68_vm0, %v35_v19  ;;  %v4142_v44 = vld [vmem:[%s5584_s3 + $0x8] sm:$0xff]   ;;  %v4146_v48 = vld [vmem:[%s5584_s3] sm:$0xff]   ;;  %v4149_v51 = vld [vmem:[%s5584_s3 + $0x1f8] sm:$0xff]  }
  0x11   :  { %323 = vmatprep.mubr.f32.mxu0 %v4180_v3  ;;  %412 = vmatprep.mubr.f32.mxu1 %v4180_v3  ;;  %v4143_v45 = vld [vmem:[%s5584_s3 + $0x88] sm:$0xff]   ;;  %v4147_v49 = vld [vmem:[%s5584_s3 + $0x80] sm:$0xff]  }
  0x14   :  { %3421 = vmatmul.mubr.msk.f32.vlgmr.msra.gmra.mxu0 %vm68_vm0, %v32_v5  ;;  %3425 = vmatmul.mubr.msk.f32.vlgmr.msra.gmra.mxu1 %vm68_vm0, %v32_v5 }
  0x15   :  { %329 = vmatprep.mubr.f32.mxu0 %v4180_v3  ;;  %418 = vmatprep.mubr.f32.mxu1 %v4180_v3 }
  0x16   :  { %3550 = vmatpush3.bf16.msra.mxu0 %v4118_v20  ;;  %3578 = vmatpush3.bf16.msra.mxu1 %v4119_v21 }
  0x17   :  { %3551 = vmatprep.subr.bf16.mxu0 %v4120_v22  ;;  %3579 = vmatprep.subr.bf16.mxu1 %v4121_v23 }
  0x18   :  { %3422 = vmatmul.mubr.msk.f32.gmra.mxu0 %vm68_vm0, %v33_v10  ;;  %3426 = vmatmul.mubr.msk.f32.gmra.mxu1 %vm68_vm0, %v33_v10 }
  0x19   :  { %335 = vmatprep.mubr.f32.mxu0 %v4180_v3  ;;  %424 = vmatprep.mubr.f32.mxu1 %v4180_v3 }
  0x1a   :  { %3552 = vmatpush3.bf16.msra.mxu0 %v4122_v24  ;;  %3580 = vmatpush3.bf16.msra.mxu1 %v4123_v25  ;;  %v4150_v25 = vld [vmem:[%s5584_s3 + $0x138] sm:$0xff]  }
  0x1b   :  { %3553 = vmatprep.subr.bf16.mxu0 %v4124_v26  ;;  %3581 = vmatprep.subr.bf16.mxu1 %v4125_v27  ;;  %v4151_v26 = vld [vmem:[%s5584_s3 + $0x1b8] sm:$0xff]  }
  0x1c   :  { %3423 = vmatmul.mubr.msk.f32.gmra.mxu0 %vm68_vm0, %v34_v11  ;;  %3427 = vmatmul.mubr.msk.f32.gmra.mxu1 %vm68_vm0, %v34_v11 }
  0x1d   :  { %341 = vmatprep.mubr.f32.mxu0 %v4180_v3  ;;  %430 = vmatprep.mubr.f32.mxu1 %v4180_v3 }
  0x1e   :  { %3554 = vmatpush3.bf16.msra.mxu0 %v4126_v28  ;;  %3582 = vmatpush3.bf16.msra.mxu1 %v4127_v29 }
  0x1f   :  { %3555 = vmatprep.subr.bf16.mxu0 %v4128_v30  ;;  %3583 = vmatprep.subr.bf16.mxu1 %v4129_v31  ;;  %v4152_v31 = vld [vmem:[%s5584_s3 + $0x170] sm:$0xff]  }
  0x20   :  { %3424 = vmatmul.mubr.msk.f32.gmra.mxu0 %vm68_vm0, %v35_v19  ;;  %3428 = vmatmul.mubr.msk.f32.gmra.mxu1 %vm68_vm0, %v35_v19 }
  0x22   :  { %3556 = vmatpush3.bf16.msra.mxu0 %v4130_v32  ;;  %3584 = vmatpush3.bf16.msra.mxu1 %v4131_v33  ;;  %v4153_v32 = vld [vmem:[%s5584_s3 + $0x1f0] sm:$0xff]  }
  0x23   :  { %3557 = vmatprep.subr.bf16.mxu0 %v4132_v34  ;;  %3585 = vmatprep.subr.bf16.mxu1 %v4133_v35 }
  0x26   :  { %3558 = vmatpush3.bf16.msra.mxu0 %v4134_v36  ;;  %3586 = vmatpush3.bf16.msra.mxu1 %v4135_v37 }
  0x27   :  { %3559 = vmatprep.subr.bf16.mxu0 %v4136_v38  ;;  %3587 = vmatprep.subr.bf16.mxu1 %v4137_v39 }
  0x2a   :  { %3560 = vmatpush3.bf16.msra.mxu0 %v4138_v40  ;;  %3588 = vmatpush3.bf16.msra.mxu1 %v4139_v41  ;;  %v4154_v40 = vld [vmem:[%s5584_s3 + $0x130] sm:$0xff]  }
  0x2b   :  { %3561 = vmatprep.subr.bf16.mxu0 %v4140_v42  ;;  %3589 = vmatprep.subr.bf16.mxu1 %v4141_v43  ;;  %v4155_v41 = vld [vmem:[%s5584_s3 + $0x1b0] sm:$0xff]  }
  0x2e   :  { %3562 = vmatpush3.bf16.msra.mxu0 %v4142_v44  ;;  %3590 = vmatpush3.bf16.msra.mxu1 %v4143_v45 }
  0x2f   :  { %3563 = vmatprep.subr.bf16.mxu0 %v4144_v46  ;;  %3591 = vmatprep.subr.bf16.mxu1 %v4145_v47 }
  0x32   :  { %3564 = vmatpush3.bf16.msra.mxu0 %v4146_v48  ;;  %3592 = vmatpush3.bf16.msra.mxu1 %v4147_v49  ;;  %v4156_v48 = vld [vmem:[%s5584_s3 + $0x168] sm:$0xff]  }
  0x33   :  { %3605 = vmatprep.subr.bf16.mxu0 %v4148_v50  ;;  %3633 = vmatprep.subr.bf16.mxu1 %v4149_v51  ;;  %v4157_v49 = vld [vmem:[%s5584_s3 + $0x1e8] sm:$0xff]  }
  0x86   :  { %v4419_v52 = vpop.permute.xlu0 %50  ;;  %v4423_v58 = vpop.permute.xlu1 %60 }
  0x8a   :  { %v4421_v57 = vpop.permute.xlu0 %55  ;;  %v4433_v18 = vpop.permute.xlu1 %65 }
  0xc4   :  { %v147_v53 = vpop.f32.mrf.mxu0  ;;  %v236_v54 = vpop.f32.mrf.mxu1 }
  0xc5   :  { %v148_v59 = vadd.f32 %v147_v53, %v4419_v52  ;;  %v237_v2 = vadd.f32 %v236_v54, %v4419_v52 }
  0xc6   :  { %v149_v55 = vpop.f32.mrf.mxu0  ;;  %v238_v56 = vpop.f32.mrf.mxu1 }
  0xc7   :  { %v150_v62 = vadd.f32 %v149_v55, %v4419_v52  ;;  %v239_v63 = vadd.f32 %v238_v56, %v4419_v52  ;;  %v437_v9 = vmax.f32 %v148_v59, 0.0  ;;  %v439_v19 = vmax.f32 %v237_v2, 0.0 }
  0xc8   :  { %v153_v60 = vpop.f32.mrf.mxu0  ;;  %v242_v61 = vpop.f32.mrf.mxu1 }
  0xc9   :  { %v154_v0 = vadd.f32 %v153_v60, %v4421_v57  ;;  %v243_v1 = vadd.f32 %v242_v61, %v4421_v57  ;;  %v438_v13 = vmax.f32 %v150_v62, 0.0  ;;  %v440_v14 = vmax.f32 %v239_v63, 0.0  ;;  %v4158_v61 = vld [vmem:[%s5584_s3 + $0x128] sm:$0xff]  }
  0xca   :  { %v155_v4 = vpop.f32.mrf.mxu0  ;;  %v244_v5 = vpop.f32.mrf.mxu1  ;;  %v4159_v62 = vld [vmem:[%s5584_s3 + $0x1a8] sm:$0xff]  }
  0xcb   :  { %v445_v6 = vmax.f32 %v154_v0, 0.0  ;;  %v156_v7 = vadd.f32 %v155_v4, %v4421_v57  ;;  %v245_v8 = vadd.f32 %v244_v5, %v4421_v57  ;;  %v447_v10 = vmax.f32 %v243_v1, 0.0 }
  0xcc   :  { %v159_v11 = vpop.f32.mrf.mxu0  ;;  %v248_v12 = vpop.f32.mrf.mxu1 }
  0xcd   :  { %v446_v16 = vmax.f32 %v156_v7, 0.0  ;;  %v448_v17 = vmax.f32 %v245_v8, 0.0  ;;  %v469_v22 = vpack.c.bf16 %v445_v6, %v437_v9  ;;  %v160_v27 = vadd.f32 %v159_v11, %v4423_v58  ;;  %v4160_v8 = vld [vmem:[%s5584_s3 + $0x160] sm:$0xff]  }
  0xce   :  { %v161_v20 = vpop.f32.mrf.mxu0  ;;  %v250_v21 = vpop.f32.mrf.mxu1  ;;  %v471_v28 = vpack.c.bf16 %v447_v10, %v439_v19  ;;  %v249_v35 = vadd.f32 %v248_v12, %v4423_v58  ;;  %v4161_v9 = vld [vmem:[%s5584_s3 + $0x1e0] sm:$0xff]  }
  0xcf   :  { %v470_v23 = vpack.c.bf16 %v446_v16, %v438_v13  ;;  %v472_v24 = vpack.c.bf16 %v448_v17, %v440_v14  ;;  %v162_v33 = vadd.f32 %v161_v20, %v4423_v58  ;;  %v251_v34 = vadd.f32 %v250_v21, %v4423_v58  ;;  %v4162_v14 = vld [vmem:[%s5584_s3 + $0x120] sm:$0xff]   ;;  %v4164_v20 = vld [vmem:[%s5584_s3 + $0x158] sm:$0xff]  }
  0xd0   :  { %v165_v29 = vpop.f32.mrf.mxu0  ;;  %v254_v30 = vpop.f32.mrf.mxu1  ;;  %v453_v44 = vmax.f32 %v160_v27, 0.0  ;;  %v455_v53 = vmax.f32 %v249_v35, 0.0  ;;  %v4163_v19 = vld [vmem:[%s5584_s3 + $0x1a0] sm:$0xff]  }
  0xd1   :  { %1029 = vmatprep.mubr.bf16.mxu0 %v470_v23  ;;  %1078 = vmatprep.mubr.bf16.mxu1 %v472_v24  ;;  %v166_v36 = vadd.f32 %v165_v29, %v4433_v18  ;;  %v255_v37 = vadd.f32 %v254_v30, %v4433_v18  ;;  %v454_v50 = vmax.f32 %v162_v33, 0.0  ;;  %v456_v51 = vmax.f32 %v251_v34, 0.0  ;;  %v4166_v30 = vld [vmem:[%s5584_s3 + $0x118] sm:$0xff]   ;;  %v4169_v33 = vld [vmem:[%s5584_s3 + $0x1d0] sm:$0xff]  }
  0xd2   :  { %v167_v38 = vpop.f32.mrf.mxu0  ;;  %v256_v39 = vpop.f32.mrf.mxu1  ;;  %1030 = vmatmul.mubr.bf16.vlgmr.msra.gmra.mxu0 %v469_v22  ;;  %1079 = vmatmul.mubr.bf16.vlgmr.msra.gmra.mxu1 %v471_v28 }
  0xd3   :  { %3606 = vmatpush3.bf16.msra.mxu0 %v4150_v25  ;;  %3634 = vmatpush3.bf16.msra.mxu1 %v4151_v26  ;;  %v168_v42 = vadd.f32 %v167_v38, %v4433_v18  ;;  %v257_v43 = vadd.f32 %v256_v39, %v4433_v18  ;;  %v461_v45 = vmax.f32 %v166_v36, 0.0  ;;  %v463_v54 = vmax.f32 %v255_v37, 0.0  ;;  %v4165_v25 = vld [vmem:[%s5584_s3 + $0x1d8] sm:$0xff]   ;;  %v4170_v36 = vld [vmem:[%s5584_s3 + $0x110] sm:$0xff]   ;;  %v4172_v38 = vld [vmem:[%s5584_s3 + $0x148] sm:$0xff]  }
  0xd4   :  { %v4461_v46 = vpop.f32.mrf.mxu0  ;;  %v4463_v47 = vpop.f32.mrf.mxu1  ;;  %3607 = vmatprep.subr.bf16.mxu0 %v4152_v31  ;;  %3635 = vmatprep.subr.bf16.mxu1 %v4153_v32  ;;  %v4167_v31 = vld [vmem:[%s5584_s3 + $0x198] sm:$0xff]   ;;  %v4168_v32 = vld [vmem:[%s5584_s3 + $0x150] sm:$0xff]   ;;  %v4173_v39 = vld [vmem:[%s5584_s3 + $0x1c8] sm:$0xff]  }
  0xd5   :  { %v462_v55 = vmax.f32 %v168_v42, 0.0  ;;  %v464_v56 = vmax.f32 %v257_v43, 0.0  ;;  %v477_v63 = vpack.c.bf16 %v461_v45, %v453_v44  ;;  %v479_v5 = vpack.c.bf16 %v463_v54, %v455_v53  ;;  %v4171_v37 = vld [vmem:[%s5584_s3 + $0x190] sm:$0xff]   ;;  %v4174_v42 = vld [vmem:[%s5584_s3 + $0x108] sm:$0xff]   ;;  %v4176_v45 = vld [vmem:[%s5584_s3 + $0x140] sm:$0xff]  }
  0xd6   :  { %v327_v59 = vpop.f32.mrf.mxu0  ;;  %v416_v60 = vpop.f32.mrf.mxu1  ;;  %v4175_v44 = vld [vmem:[%s5584_s3 + $0x188] sm:$0xff]   ;;  %v415_v54 = vadd.f32 %v4463_v47, %v4419_v52 }
  0xd7   :  { %3608 = vmatpush3.bf16.msra.mxu0 %v4154_v40  ;;  %3636 = vmatpush3.bf16.msra.mxu1 %v4155_v41  ;;  %v478_v2 = vpack.c.bf16 %v462_v55, %v454_v50  ;;  %v480_v4 = vpack.c.bf16 %v464_v56, %v456_v51  ;;  %v328_v6 = vadd.f32 %v327_v59, %v4419_v52  ;;  %v4177_v50 = vld [vmem:[%s5584_s3 + $0x1c0] sm:$0xff]  }
  0xd8   :  { %v331_v0 = vpop.f32.mrf.mxu0  ;;  %v4477_v1 = vpop.f32.mrf.mxu1  ;;  %3609 = vmatprep.subr.bf16.mxu0 %v4156_v48  ;;  %3637 = vmatprep.subr.bf16.mxu1 %v4157_v49  ;;  %v417_v7 = vadd.f32 %v416_v60, %v4419_v52  ;;  %v326_v51 = vadd.f32 %v4461_v46, %v4419_v52  ;;  %v4179_v46 = vld [vmem:[%s5584_s3 + $0x180] sm:$0xff]  }
  0xd9   :  { %1037 = vmatprep.mubr.bf16.mxu0 %v478_v2  ;;  %1086 = vmatprep.mubr.bf16.mxu1 %v480_v4  ;;  %v442_v21 = vmax.f32 %v328_v6, 0.0  ;;  %v332_v43 = vadd.f32 %v331_v0, %v4421_v57  ;;  %v421_v48 = vadd.f32 %v4477_v1, %v4421_v57 }
  0xda   :  { %v333_v10 = vpop.f32.mrf.mxu0  ;;  %v422_v11 = vpop.f32.mrf.mxu1  ;;  %1038 = vmatmul.mubr.bf16.gmra.mxu0 %v477_v63  ;;  %1087 = vmatmul.mubr.bf16.gmra.mxu1 %v479_v5  ;;  %v444_v22 = vmax.f32 %v417_v7, 0.0  ;;  %v441_v52 = vmax.f32 %v326_v51, 0.0 }
  0xdb   :  { %v334_v12 = vadd.f32 %v333_v10, %v4421_v57  ;;  %v423_v13 = vadd.f32 %v422_v11, %v4421_v57  ;;  %3610 = vmatpush3.bf16.msra.mxu0 %v4158_v61  ;;  %3638 = vmatpush3.bf16.msra.mxu1 %v4159_v62  ;;  %v4178_v57 = vld [vmem:[%s5584_s3 + $0x100] sm:$0xff]   ;;  %v449_v56 = vmax.f32 %v332_v43, 0.0  ;;  %v451_v60 = vmax.f32 %v421_v48, 0.0 }
  0xdc   :  { %v4492_v16 = vpop.f32.mrf.mxu0  ;;  %v4494_v17 = vpop.f32.mrf.mxu1  ;;  %3611 = vmatprep.subr.bf16.mxu0 %v4160_v8  ;;  %3639 = vmatprep.subr.bf16.mxu1 %v4161_v9  ;;  %v443_v62 = vmax.f32 %v415_v54, 0.0 }
  0xdd   :  { %v450_v23 = vmax.f32 %v334_v12, 0.0  ;;  %v452_v24 = vmax.f32 %v423_v13, 0.0  ;;  %v473_v0 = vpack.c.bf16 %v449_v56, %v441_v52  ;;  %v338_v7 = vadd.f32 %v4492_v16, %v4423_v58  ;;  %v1208_v16 = vld [vmem:[%s5585_s5 + $0x38] sm:$0xff] }
  0xde   :  { %v339_v26 = vpop.f32.mrf.mxu0  ;;  %v428_v29 = vpop.f32.mrf.mxu1  ;;  %v475_v4 = vpack.c.bf16 %v451_v60, %v443_v62  ;;  %v427_v9 = vadd.f32 %v4494_v17, %v4423_v58  ;;  %v1215_v17 = vld [vmem:[%s5585_s5 + $0x70] sm:$0xff] }
  0xdf   :  { %v474_v27 = vpack.c.bf16 %v450_v23, %v442_v21  ;;  %v476_v28 = vpack.c.bf16 %v452_v24, %v444_v22  ;;  %3612 = vmatpush3.bf16.msra.mxu0 %v4162_v14  ;;  %3640 = vmatpush3.bf16.msra.mxu1 %v4163_v19  ;;  %v340_v55 = vadd.f32 %v339_v26, %v4423_v58  ;;  %v457_v12 = vmax.f32 %v338_v7, 0.0  ;;  %v1216_v19 = vld [vmem:[%s5585_s5 + $0x78] sm:$0xff]  ;;  %v1214_v21 = vld [vmem:[%s5585_s5 + $0x68] sm:$0xff]  ;;  %v1205_v22 = vld [vmem:[%s5585_s5 + $0x20] sm:$0xff] }
  0xe0   :  { %3613 = vmatprep.subr.bf16.mxu0 %v4164_v20  ;;  %3641 = vmatprep.subr.bf16.mxu1 %v4165_v25  ;;  %v343_v34 = vpop.f32.mrf.mxu0  ;;  %v432_v35 = vpop.f32.mrf.mxu1  ;;  %v429_v59 = vadd.f32 %v428_v29, %v4423_v58  ;;  %v459_v13 = vmax.f32 %v427_v9, 0.0  ;;  %v1207_v58 = vld [vmem:[%s5585_s5 + $0x30] sm:$0xff]  ;;  %v1206_v20 = vld [vmem:[%s5585_s5 + $0x28] sm:$0xff]  ;;  %v1213_v23 = vld [vmem:[%s5585_s5 + $0x60] sm:$0xff] }
  0xe1   :  { %1127 = vmatprep.mubr.bf16.mxu0 %v474_v27  ;;  %1176 = vmatprep.mubr.bf16.mxu1 %v476_v28  ;;  %v458_v63 = vmax.f32 %v340_v55, 0.0  ;;  %v344_v2 = vadd.f32 %v343_v34, %v4433_v18  ;;  %v433_v5 = vadd.f32 %v432_v35, %v4433_v18  ;;  %v1204_v24 = vld [vmem:[%s5585_s5 + $0x18] sm:$0xff]  ;;  %v1203_v26 = vld [vmem:[%s5585_s5 + $0x10] sm:$0xff]  ;;  %v1202_v28 = vld [vmem:[%s5585_s5 + $0x8] sm:$0xff] }
  0xe2   :  { %v345_v40 = vpop.f32.mrf.mxu0  ;;  %v434_v41 = vpop.f32.mrf.mxu1  ;;  %v460_v1 = vmax.f32 %v429_v59, 0.0  ;;  %v1212_v25 = vld [vmem:[%s5585_s5 + $0x58] sm:$0xff]  ;;  %v1211_v27 = vld [vmem:[%s5585_s5 + $0x50] sm:$0xff]  ;;  %v1210_v29 = vld [vmem:[%s5585_s5 + $0x48] sm:$0xff] }
  0xe3   :  { %3614 = vmatpush3.bf16.msra.mxu0 %v4166_v30  ;;  %3642 = vmatpush3.bf16.msra.mxu1 %v4167_v31  ;;  %v346_v49 = vadd.f32 %v345_v40, %v4433_v18  ;;  %v435_v53 = vadd.f32 %v434_v41, %v4433_v18  ;;  %v465_v10 = vmax.f32 %v344_v2, 0.0  ;;  %v467_v11 = vmax.f32 %v433_v5, 0.0  ;;  %v1201_v30 = vld [vmem:[%s5585_s5] sm:$0xff] }
  0xe4   :  { %3615 = vmatprep.subr.bf16.mxu0 %v4168_v32  ;;  %3643 = vmatprep.subr.bf16.mxu1 %v4169_v33  ;;  %v1209_v31 = vld [vmem:[%s5585_s5 + $0x40] sm:$0xff] }
  0xe5   :  { %v466_v61 = vmax.f32 %v346_v49, 0.0  ;;  %v468_v47 = vmax.f32 %v435_v53, 0.0  ;;  %v481_v14 = vpack.c.bf16 %v465_v10, %v457_v12  ;;  %v483_v18 = vpack.c.bf16 %v467_v11, %v459_v13  ;;  %v1453_v11 = vld [vmem:[%s5585_s5 + $0xf8] sm:$0xff] }
  0xe7   :  { %3616 = vmatpush3.bf16.msra.mxu0 %v4170_v36  ;;  %3644 = vmatpush3.bf16.msra.mxu1 %v4171_v37  ;;  %v482_v6 = vpack.c.bf16 %v466_v61, %v458_v63  ;;  %v484_v8 = vpack.c.bf16 %v468_v47, %v460_v1 }
  0xe8   :  { %3617 = vmatprep.subr.bf16.mxu0 %v4172_v38  ;;  %3645 = vmatprep.subr.bf16.mxu1 %v4173_v39 }
  0xeb   :  { %3618 = vmatpush3.bf16.msra.mxu0 %v4174_v42  ;;  %3646 = vmatpush3.bf16.msra.mxu1 %v4175_v44 }
  0xec   :  { %3619 = vmatprep.subr.bf16.mxu0 %v4176_v45  ;;  %3647 = vmatprep.subr.bf16.mxu1 %v4177_v50 }
  0xef   :  { %3620 = vmatpush3.bf16.msra.mxu0 %v4178_v57  ;;  %3648 = vmatpush3.bf16.msra.mxu1 %v4179_v46 }
  0xf0   :  { %3805 = vmatprep.subr.mxu0 %v4180_v3  ;;  %3824 = vmatprep.subr.mxu1 %v4180_v3 }
  0xf2   :  { %1128 = vmatmul.mubr.bf16.vlgmr.msra.gmra.mxu0 %v473_v0  ;;  %1177 = vmatmul.mubr.bf16.vlgmr.msra.gmra.mxu1 %v475_v4  ;;  %v1193_v4 = vld [vmem:[%s5586_s4] sm:$0xff] }
  0xf3   :  { %1135 = vmatprep.mubr.bf16.mxu0 %v482_v6  ;;  %1184 = vmatprep.mubr.bf16.mxu1 %v484_v8 }
  0xf4   :  { %3825 = vmatpush3.msra.mxu1 %v1208_v16  ;;  %3806 = vmatpush3.msra.mxu0 %v1216_v19  ;;  %v1371_v16 = vld [vmem:[%s5585_s5 + $0xb8] sm:$0xff]  ;;  %v1452_v19 = vld [vmem:[%s5585_s5 + $0xf0] sm:$0xff] }
  0xf5   :  { %3826 = vmatprep.subr.mxu1 %v4180_v3  ;;  %3807 = vmatprep.subr.mxu0 %v4180_v3 }
  0xf6   :  { %3827 = vmatpush3.msra.mxu1 %v1207_v58  ;;  %3808 = vmatpush3.msra.mxu0 %v1215_v17 }
  0xf7   :  { %3828 = vmatprep.subr.mxu1 %v4180_v3  ;;  %3809 = vmatprep.subr.mxu0 %v4180_v3 }
  0xf8   :  { %3829 = vmatpush3.msra.mxu1 %v1206_v20  ;;  %3810 = vmatpush3.msra.mxu0 %v1214_v21 }
  0xf9   :  { %3830 = vmatprep.subr.mxu1 %v4180_v3  ;;  %3811 = vmatprep.subr.mxu0 %v4180_v3 }
  0xfa   :  { %1136 = vmatmul.mubr.bf16.gmra.mxu0 %v481_v14  ;;  %1185 = vmatmul.mubr.bf16.gmra.mxu1 %v483_v18 }
  0xfb   :  { %3831 = vmatpush3.msra.mxu1 %v1205_v22  ;;  %3812 = vmatpush3.msra.mxu0 %v1213_v23  ;;  %v1370_v22 = vld [vmem:[%s5585_s5 + $0xb0] sm:$0xff]  ;;  %v1451_v23 = vld [vmem:[%s5585_s5 + $0xe8] sm:$0xff] }
  0xfc   :  { %3832 = vmatprep.subr.mxu1 %v4180_v3  ;;  %3813 = vmatprep.subr.mxu0 %v4180_v3 }
  0xfd   :  { %3833 = vmatpush3.msra.mxu1 %v1204_v24  ;;  %3814 = vmatpush3.msra.mxu0 %v1212_v25  ;;  %v1195_v24 = vld [vmem:[%s5586_s4 + $0x10] sm:$0xff] }
  0xfe   :  { %3834 = vmatprep.subr.mxu1 %v4180_v3  ;;  %3815 = vmatprep.subr.mxu0 %v4180_v3 }
  0xff   :  { %3835 = vmatpush3.msra.mxu1 %v1203_v26  ;;  %3816 = vmatpush3.msra.mxu0 %v1211_v27 }
 0x100   :  { %3836 = vmatprep.subr.mxu1 %v4180_v3  ;;  %3817 = vmatprep.subr.mxu0 %v4180_v3 }
 0x101   :  { %3837 = vmatpush3.msra.mxu1 %v1202_v28  ;;  %3818 = vmatpush3.msra.mxu0 %v1210_v29  ;;  %v1369_v29 = vld [vmem:[%s5585_s5 + $0xa8] sm:$0xff] }
 0x102   :  { %3838 = vmatprep.subr.mxu1 %v4180_v3  ;;  %3819 = vmatprep.subr.mxu0 %v4180_v3 }
 0x103   :  { %3839 = vmatpush3.msra.mxu1 %v1201_v30  ;;  %3840 = vmatprep.mubr.msk.f32.mxu1 %vm4182_vm1, %v4180_v3  ;;  %v1450_v30 = vld [vmem:[%s5585_s5 + $0xe0] sm:$0xff] }
 0x104   :  { %3862 = vmatprep.subr.mxu1 %v4180_v3  ;;  %3820 = vmatpush3.msra.mxu0 %v1209_v31 }
 0x105   :  { %3821 = vmatprep.mubr.msk.f32.mxu0 %vm4182_vm1, %v4180_v3  ;;  %3843 = vmatprep.subr.mxu0 %v4180_v3 }
 0x192   :  { %v3565_v32 = vpop.f32.mrf.mxu0  ;;  %v3593_v33 = vpop.f32.mrf.mxu1 }
 0x194   :  { %v3566_v34 = vpop.f32.mrf.mxu0  ;;  %v3594_v35 = vpop.f32.mrf.mxu1 }
 0x195   :  { %v3567_v56 = vadd.f32 %v3566_v34, %v3565_v32  ;;  %v3595_v59 = vadd.f32 %v3594_v35, %v3593_v33  ;;  %v1368_v34 = vld [vmem:[%s5585_s5 + $0xa0] sm:$0xff]  ;;  %v1449_v35 = vld [vmem:[%s5585_s5 + $0xd8] sm:$0xff] }
 0x196   :  { %v4634_v36 = vpop.f32.mrf.mxu0  ;;  %v4636_v37 = vpop.f32.mrf.mxu1 }
 0x197   :  { %v1081_v52 = vadd.f32 %v3595_v59, %v3567_v56  ;;  %v1616_v56 = vld [vmem:[%s5585_s5 + $0x170] sm:$0xff] }
 0x198   :  { %v4638_v38 = vpop.f32.mrf.mxu0  ;;  %v4640_v39 = vpop.f32.mrf.mxu1  ;;  %v1534_v59 = vld [vmem:[%s5585_s5 + $0x130] sm:$0xff] }
 0x19a   :  { %v3571_v40 = vpop.f32.mrf.mxu0  ;;  %v3599_v41 = vpop.f32.mrf.mxu1 }
 0x19c   :  { %v3572_v42 = vpop.f32.mrf.mxu0  ;;  %v3600_v43 = vpop.f32.mrf.mxu1 }
 0x19d   :  { %v3573_v44 = vadd.f32 %v3572_v42, %v3571_v40  ;;  %v3601_v45 = vadd.f32 %v3600_v43, %v3599_v41  ;;  %v1196_v40 = vld [vmem:[%s5586_s4 + $0x18] sm:$0xff]  ;;  %v1448_v43 = vld [vmem:[%s5585_s5 + $0xd0] sm:$0xff] }
 0x19e   :  { %v3574_v48 = vpop.f32.mrf.mxu0  ;;  %v3602_v49 = vpop.f32.mrf.mxu1  ;;  %v1367_v42 = vld [vmem:[%s5585_s5 + $0x98] sm:$0xff] }
 0x19f   :  { %v1089_v50 = vadd.f32 %v3601_v45, %v3573_v44  ;;  %v1366_v45 = vld [vmem:[%s5585_s5 + $0x90] sm:$0xff] }
 0x1a0   :  { %v3575_v51 = vpop.f32.mrf.mxu0  ;;  %v3603_v53 = vpop.f32.mrf.mxu1 }
 0x1a1   :  { %v3576_v54 = vadd.f32 %v3575_v51, %v3574_v48  ;;  %v3604_v55 = vadd.f32 %v3603_v53, %v3602_v49  ;;  %v1447_v48 = vld [vmem:[%s5585_s5 + $0xc8] sm:$0xff]  ;;  %v3570_v51 = vadd.f32 %v4638_v38, %v4634_v36  ;;  %v3598_v53 = vadd.f32 %v4640_v39, %v4636_v37  ;;  %v1535_v38 = vld [vmem:[%s5585_s5 + $0x138] sm:$0xff] }
 0x1a2   :  { %v1365_v49 = vld [vmem:[%s5585_s5 + $0x88] sm:$0xff] }
 0x1a3   :  { %v1092_v57 = vadd.f32 %v3604_v55, %v3576_v54  ;;  %v1364_v55 = vld [vmem:[%s5585_s5 + $0x80] sm:$0xff]  ;;  %v1084_v39 = vadd.f32 %v3598_v53, %v3570_v51  ;;  %v1939_v51 = vld [vmem:[%s5585_s5 + $0x248] sm:$0xff] }
 0x1a4   :  { %v1857_v53 = vld [vmem:[%s5585_s5 + $0x208] sm:$0xff] }
 0x1b2   :  { %v3621_v46 = vpop.f32.mrf.mxu0  ;;  %v3649_v60 = vpop.f32.mrf.mxu1 }
 0x1b4   :  { %v3622_v61 = vpop.f32.mrf.mxu0  ;;  %v3650_v62 = vpop.f32.mrf.mxu1 }
 0x1b5   :  { %v3623_v47 = vadd.f32 %v3622_v61, %v3621_v46  ;;  %v3651_v1 = vadd.f32 %v3650_v62, %v3649_v60  ;;  %v1615_v60 = vld [vmem:[%s5585_s5 + $0x168] sm:$0xff]  ;;  %v1532_v62 = vld [vmem:[%s5585_s5 + $0x120] sm:$0xff] }
 0x1b6   :  { %v4642_v63 = vpop.f32.mrf.mxu0  ;;  %v4644_v2 = vpop.f32.mrf.mxu1  ;;  %v1533_v61 = vld [vmem:[%s5585_s5 + $0x128] sm:$0xff] }
 0x1b7   :  { %v1130_v0 = vadd.f32 %v3623_v47, %v1081_v52  ;;  %v1614_v47 = vld [vmem:[%s5585_s5 + $0x160] sm:$0xff] }
 0x1b8   :  { %v4649_v5 = vpop.f32.mrf.mxu0  ;;  %v4651_v7 = vpop.f32.mrf.mxu1 }
 0x1b9   :  { %v1179_v6 = vadd.f32 %v3651_v1, %v1130_v0  ;;  %v3626_v36 = vadd.f32 %v4649_v5, %v4642_v63  ;;  %v3654_v52 = vadd.f32 %v4651_v7, %v4644_v2  ;;  %v1613_v0 = vld [vmem:[%s5585_s5 + $0x158] sm:$0xff]  ;;  %v1194_v1 = vld [vmem:[%s5586_s4 + $0x8] sm:$0xff]  ;;  %v1530_v5 = vld [vmem:[%s5585_s5 + $0x110] sm:$0xff] }
 0x1ba   :  { %v3627_v8 = vpop.f32.mrf.mxu0  ;;  %v3655_v10 = vpop.f32.mrf.mxu1  ;;  %v1531_v2 = vld [vmem:[%s5585_s5 + $0x118] sm:$0xff]  ;;  %v1611_v7 = vld [vmem:[%s5585_s5 + $0x148] sm:$0xff] }
 0x1bb   :  { %v4653_v9 = vsub.f32 %v1179_v6, %v1193_v4  ;;  %v1133_v46 = vadd.f32 %v3626_v36, %v1084_v39  ;;  %v1612_v4 = vld [vmem:[%s5585_s5 + $0x150] sm:$0xff]  ;;  %v2109_v36 = vld [vmem:[%s5585_s5 + $0x2f8] sm:$0xff] }
 0x1bc   :  { %v3628_v12 = vpop.f32.mrf.mxu0  ;;  %v3656_v14 = vpop.f32.mrf.mxu1  ;;  %v2026_v39 = vld [vmem:[%s5585_s5 + $0x2b0] sm:$0xff] }
 0x1bd   :  { %v3629_v13 = vadd.f32 %v3628_v12, %v3627_v8  ;;  %3841 = vmatmul.mubr.msk.f32.vlgmr.msra.gmra.mxu1 %vm1219_vm2, %v4653_v9  ;;  %v1218_v18 = vrot.slane %v4653_v9, 2  ;;  %v3657_v20 = vadd.f32 %v3656_v14, %v3655_v10  ;;  %v1454_v54 = vrot.slane %v4653_v9, 6  ;;  %v1529_v8 = vld [vmem:[%s5585_s5 + $0x108] sm:$0xff]  ;;  %v1610_v10 = vld [vmem:[%s5585_s5 + $0x140] sm:$0xff]  ;;  %v1699_v14 = vld [vmem:[%s5585_s5 + $0x1b8] sm:$0xff] }
 0x1be   :  { %3863 = vmatpush3.msra.mxu1 %v1453_v11  ;;  %v3630_v58 = vpop.f32.mrf.mxu0  ;;  %3878 = vmatprep.mubr.msk.f32.mxu1 %vm4182_vm1, %v4180_v3  ;;  %v3658_v21 = vpop.f32.mrf.mxu1  ;;  %v1372_v37 = vrot.slane %v4653_v9, 4  ;;  %v1182_v63 = vadd.f32 %v3654_v52, %v1133_v46  ;;  %v1528_v12 = vld [vmem:[%s5585_s5 + $0x100] sm:$0xff]  ;;  %v2023_v52 = vld [vmem:[%s5585_s5 + $0x298] sm:$0xff] }
 0x1bf   :  { %v1138_v17 = vadd.f32 %v3629_v13, %v1089_v50  ;;  %3864 = vmatprep.subr.mxu1 %v4180_v3  ;;  %3822 = vmatmul.mubr.msk.f32.vlgmr.msra.gmra.mxu0 %vm1219_vm2, %v1218_v18  ;;  %v1446_v50 = vld [vmem:[%s5585_s5 + $0xc0] sm:$0xff]  ;;  %v1781_v13 = vld [vmem:[%s5585_s5 + $0x1f8] sm:$0xff]  ;;  %v1780_v18 = vld [vmem:[%s5585_s5 + $0x1f0] sm:$0xff] }
 0x1c0   :  { %3844 = vmatpush3.msra.mxu0 %v1371_v16  ;;  %3865 = vmatpush3.msra.mxu1 %v1452_v19  ;;  %v3631_v25 = vpop.f32.mrf.mxu0  ;;  %v3659_v28 = vpop.f32.mrf.mxu1  ;;  %v4796_v6 = vsub.f32 %v1182_v63, %v1194_v1  ;;  %v1698_v16 = vld [vmem:[%s5585_s5 + $0x1b0] sm:$0xff]  ;;  %v1779_v19 = vld [vmem:[%s5585_s5 + $0x1e8] sm:$0xff]  ;;  %v2106_v46 = vld [vmem:[%s5585_s5 + $0x2e0] sm:$0xff] }
 0x1c1   :  { %v1187_v26 = vadd.f32 %v3657_v20, %v1138_v17  ;;  %v3632_v27 = vadd.f32 %v3631_v25, %v3630_v58  ;;  %3845 = vmatprep.subr.mxu0 %v4180_v3  ;;  %3866 = vmatprep.subr.mxu1 %v4180_v3  ;;  %v3660_v33 = vadd.f32 %v3659_v28, %v3658_v21  ;;  %v1697_v58 = vld [vmem:[%s5585_s5 + $0x1a8] sm:$0xff]  ;;  %v1778_v17 = vld [vmem:[%s5585_s5 + $0x1e0] sm:$0xff]  ;;  %v1777_v21 = vld [vmem:[%s5585_s5 + $0x1d8] sm:$0xff] }
 0x1c2   :  { %3846 = vmatpush3.msra.mxu0 %v1370_v22  ;;  %3867 = vmatpush3.msra.mxu1 %v1451_v23  ;;  %v1618_v11 = vrot.slane %v4796_v6, 2  ;;  %v1696_v20 = vld [vmem:[%s5585_s5 + $0x1a0] sm:$0xff]  ;;  %v1695_v22 = vld [vmem:[%s5585_s5 + $0x198] sm:$0xff]  ;;  %v1776_v23 = vld [vmem:[%s5585_s5 + $0x1d0] sm:$0xff]  ;;  %v1782_v28 = vrot.slane %v4796_v6, 6 }
 0x1c3   :  { %v4688_v31 = vsub.f32 %v1187_v26, %v1195_v24  ;;  %v1141_v32 = vadd.f32 %v3632_v27, %v1092_v57  ;;  %3847 = vmatprep.subr.mxu0 %v4180_v3  ;;  %3868 = vmatprep.subr.mxu1 %v4180_v3  ;;  %v1617_v57 = vld [vmem:[%s5585_s5 + $0x178] sm:$0xff]  ;;  %v1694_v24 = vld [vmem:[%s5585_s5 + $0x190] sm:$0xff]  ;;  %v1775_v25 = vld [vmem:[%s5585_s5 + $0x1c8] sm:$0xff] }
 0x1c4   :  { %3848 = vmatpush3.msra.mxu0 %v1369_v29  ;;  %3869 = vmatpush3.msra.mxu1 %v1450_v30  ;;  %v1693_v26 = vld [vmem:[%s5585_s5 + $0x188] sm:$0xff]  ;;  %v1774_v27 = vld [vmem:[%s5585_s5 + $0x1c0] sm:$0xff]  ;;  %v1945_v30 = vld [vmem:[%s5585_s5 + $0x278] sm:$0xff] }
 0x1c5   :  { %v1190_v41 = vadd.f32 %v3660_v33, %v1141_v32  ;;  %3849 = vmatprep.subr.mxu0 %v4180_v3  ;;  %3870 = vmatprep.subr.mxu1 %v4180_v3  ;;  %v1692_v29 = vld [vmem:[%s5585_s5 + $0x180] sm:$0xff]  ;;  %v1700_v32 = vrot.slane %v4796_v6, 4  ;;  %v1863_v33 = vld [vmem:[%s5585_s5 + $0x238] sm:$0xff]  ;;  %v2103_v63 = vld [vmem:[%s5585_s5 + $0x2c8] sm:$0xff] }
 0x1c6   :  { %3850 = vmatpush3.msra.mxu0 %v1368_v34  ;;  %3871 = vmatpush3.msra.mxu1 %v1449_v35  ;;  %v1944_v34 = vld [vmem:[%s5585_s5 + $0x270] sm:$0xff]  ;;  %v2102_v1 = vld [vmem:[%s5585_s5 + $0x2c0] sm:$0xff] }
 0x1c7   :  { %v4709_v44 = vsub.f32 %v1190_v41, %v1196_v40  ;;  %3851 = vmatprep.subr.mxu0 %v4180_v3  ;;  %3872 = vmatprep.subr.mxu1 %v4180_v3  ;;  %v1862_v35 = vld [vmem:[%s5585_s5 + $0x230] sm:$0xff]  ;;  %v1943_v40 = vld [vmem:[%s5585_s5 + $0x268] sm:$0xff] }
 0x1c8   :  { %3852 = vmatpush3.msra.mxu0 %v1367_v42  ;;  %3873 = vmatpush3.msra.mxu1 %v1448_v43  ;;  %v1861_v41 = vld [vmem:[%s5585_s5 + $0x228] sm:$0xff]  ;;  %v1942_v42 = vld [vmem:[%s5585_s5 + $0x260] sm:$0xff] }
 0x1c9   :  { %3853 = vmatprep.subr.mxu0 %v4180_v3  ;;  %3874 = vmatprep.subr.mxu1 %v4180_v3  ;;  %v1860_v43 = vld [vmem:[%s5585_s5 + $0x220] sm:$0xff] }
 0x1ca   :  { %3854 = vmatpush3.msra.mxu0 %v1366_v45  ;;  %3875 = vmatpush3.msra.mxu1 %v1447_v48  ;;  %v1941_v45 = vld [vmem:[%s5585_s5 + $0x258] sm:$0xff] }
 0x1cb   :  { %3855 = vmatprep.subr.mxu0 %v4180_v3  ;;  %3876 = vmatprep.subr.mxu1 %v4180_v3  ;;  %v1859_v48 = vld [vmem:[%s5585_s5 + $0x218] sm:$0xff] }
 0x1cc   :  { %3856 = vmatpush3.msra.mxu0 %v1365_v49  ;;  %3877 = vmatpush3.msra.mxu1 %v1446_v50  ;;  %v1940_v49 = vld [vmem:[%s5585_s5 + $0x250] sm:$0xff] }
 0x1cd   :  { %3857 = vmatprep.subr.mxu0 %v4180_v3  ;;  %3879 = vmatmul.mubr.msk.f32.vlgmr.msra.gmra.mxu1 %vm1219_vm2, %v1454_v54  ;;  %v1858_v50 = vld [vmem:[%s5585_s5 + $0x210] sm:$0xff]  ;;  %v1938_v54 = vld [vmem:[%s5585_s5 + $0x240] sm:$0xff] }
 0x1ce   :  { %3900 = vmatprep.subr.mxu1 %v4180_v3  ;;  %3858 = vmatpush3.msra.mxu0 %v1364_v55  ;;  %v1946_v55 = vrot.slane %v4688_v31, 2 }
 0x1cf   :  { %3859 = vmatprep.mubr.msk.f32.mxu0 %vm4182_vm1, %v4180_v3  ;;  %3901 = vmatpush3.msra.mxu1 %v1617_v57  ;;  %v1856_v57 = vld [vmem:[%s5585_s5 + $0x200] sm:$0xff] }
 0x1d0   :  { %3860 = vmatmul.mubr.msk.f32.vlgmr.msra.gmra.mxu0 %vm1219_vm2, %v1372_v37  ;;  %3881 = vmatprep.subr.mxu0 %v4180_v3  ;;  %v2027_v37 = vld [vmem:[%s5585_s5 + $0x2b8] sm:$0xff] }
 0x1d1   :  { %3902 = vmatprep.subr.mxu1 %v4180_v3  ;;  %3882 = vmatpush3.msra.mxu0 %v1535_v38  ;;  %v2108_v38 = vld [vmem:[%s5585_s5 + $0x2f0] sm:$0xff] }
 0x1d2   :  { %3903 = vmatpush3.msra.mxu1 %v1616_v56  ;;  %3883 = vmatprep.subr.mxu0 %v4180_v3  ;;  %v2107_v56 = vld [vmem:[%s5585_s5 + $0x2e8] sm:$0xff] }
 0x1d3   :  { %3904 = vmatprep.subr.mxu1 %v4180_v3  ;;  %3884 = vmatpush3.msra.mxu0 %v1534_v59  ;;  %v2025_v59 = vld [vmem:[%s5585_s5 + $0x2a8] sm:$0xff] }
 0x1d4   :  { %3905 = vmatpush3.msra.mxu1 %v1615_v60  ;;  %3885 = vmatprep.subr.mxu0 %v4180_v3  ;;  %v2024_v60 = vld [vmem:[%s5585_s5 + $0x2a0] sm:$0xff] }
 0x1d5   :  { %3906 = vmatprep.subr.mxu1 %v4180_v3  ;;  %3886 = vmatpush3.msra.mxu0 %v1533_v61  ;;  %v2105_v61 = vld [vmem:[%s5585_s5 + $0x2d8] sm:$0xff] }
 0x1d6   :  { %3907 = vmatpush3.msra.mxu1 %v1614_v47  ;;  %3887 = vmatprep.subr.mxu0 %v4180_v3  ;;  %v2104_v47 = vld [vmem:[%s5585_s5 + $0x2d0] sm:$0xff] }
 0x1d7   :  { %3908 = vmatprep.subr.mxu1 %v4180_v3  ;;  %3888 = vmatpush3.msra.mxu0 %v1532_v62  ;;  %v2022_v62 = vld [vmem:[%s5585_s5 + $0x290] sm:$0xff] }
 0x1d8   :  { %3909 = vmatpush3.msra.mxu1 %v1613_v0  ;;  %3889 = vmatprep.subr.mxu0 %v4180_v3  ;;  %v2021_v0 = vld [vmem:[%s5585_s5 + $0x288] sm:$0xff] }
 0x1d9   :  { %3910 = vmatprep.subr.mxu1 %v4180_v3  ;;  %3890 = vmatpush3.msra.mxu0 %v1531_v2  ;;  %v2110_v2 = vrot.slane %v4688_v31, 6 }
 0x1da   :  { %3911 = vmatpush3.msra.mxu1 %v1612_v4  ;;  %3891 = vmatprep.subr.mxu0 %v4180_v3  ;;  %v2020_v4 = vld [vmem:[%s5585_s5 + $0x280] sm:$0xff] }
 0x1db   :  { %3912 = vmatprep.subr.mxu1 %v4180_v3  ;;  %3892 = vmatpush3.msra.mxu0 %v1530_v5  ;;  %v2273_v5 = vld [vmem:[%s5585_s5 + $0x378] sm:$0xff] }
 0x1dc   :  { %3913 = vmatpush3.msra.mxu1 %v1611_v7  ;;  %3893 = vmatprep.subr.mxu0 %v4180_v3  ;;  %v2028_v7 = vrot.slane %v4688_v31, 4 }
 0x1dd   :  { %3914 = vmatprep.subr.mxu1 %v4180_v3  ;;  %3894 = vmatpush3.msra.mxu0 %v1529_v8  ;;  %v2191_v8 = vld [vmem:[%s5585_s5 + $0x338] sm:$0xff] }
 0x1de   :  { %3915 = vmatpush3.msra.mxu1 %v1610_v10  ;;  %3916 = vmatprep.mubr.msk.f32.mxu1 %vm4182_vm1, %v4180_v3  ;;  %v2272_v10 = vld [vmem:[%s5585_s5 + $0x370] sm:$0xff] }
 0x1df   :  { %3895 = vmatprep.subr.mxu0 %v4180_v3  ;;  %3917 = vmatmul.mubr.msk.f32.vlgmr.msra.gmra.mxu1 %vm1219_vm2, %v1618_v11  ;;  %v2190_v11 = vld [vmem:[%s5585_s5 + $0x330] sm:$0xff] }
 0x1e0   :  { %3938 = vmatprep.subr.mxu1 %v4180_v3  ;;  %3896 = vmatpush3.msra.mxu0 %v1528_v12  ;;  %v2271_v12 = vld [vmem:[%s5585_s5 + $0x368] sm:$0xff] }
 0x1e1   :  { %3897 = vmatprep.mubr.msk.f32.mxu0 %vm4182_vm1, %v4180_v3  ;;  %3939 = vmatpush3.msra.mxu1 %v1781_v13  ;;  %v2189_v13 = vld [vmem:[%s5585_s5 + $0x328] sm:$0xff] }
 0x1e2   :  { %3898 = vmatmul.mubr.msk.f32.vlgmr.msra.gmra.mxu0 %vm1219_vm2, %v4796_v6  ;;  %3919 = vmatprep.subr.mxu0 %v4180_v3 }
 0x1e3   :  { %3940 = vmatprep.subr.mxu1 %v4180_v3  ;;  %3920 = vmatpush3.msra.mxu0 %v1699_v14  ;;  %v2270_v14 = vld [vmem:[%s5585_s5 + $0x360] sm:$0xff] }
 0x1e4   :  { %3941 = vmatpush3.msra.mxu1 %v1780_v18  ;;  %3921 = vmatprep.subr.mxu0 %v4180_v3  ;;  %v2188_v18 = vld [vmem:[%s5585_s5 + $0x320] sm:$0xff] }
 0x1e5   :  { %3942 = vmatprep.subr.mxu1 %v4180_v3  ;;  %3922 = vmatpush3.msra.mxu0 %v1698_v16  ;;  %v2269_v16 = vld [vmem:[%s5585_s5 + $0x358] sm:$0xff] }
 0x1e6   :  { %3943 = vmatpush3.msra.mxu1 %v1779_v19  ;;  %3923 = vmatprep.subr.mxu0 %v4180_v3  ;;  %v2187_v19 = vld [vmem:[%s5585_s5 + $0x318] sm:$0xff] }
 0x1e7   :  { %3944 = vmatprep.subr.mxu1 %v4180_v3  ;;  %3924 = vmatpush3.msra.mxu0 %v1697_v58  ;;  %v2268_v58 = vld [vmem:[%s5585_s5 + $0x350] sm:$0xff] }
 0x1e8   :  { %3945 = vmatpush3.msra.mxu1 %v1778_v17  ;;  %3925 = vmatprep.subr.mxu0 %v4180_v3  ;;  %v2186_v17 = vld [vmem:[%s5585_s5 + $0x310] sm:$0xff] }
 0x1e9   :  { %3946 = vmatprep.subr.mxu1 %v4180_v3  ;;  %3926 = vmatpush3.msra.mxu0 %v1696_v20  ;;  %v2267_v20 = vld [vmem:[%s5585_s5 + $0x348] sm:$0xff] }
 0x1ea   :  { %3947 = vmatpush3.msra.mxu1 %v1777_v21  ;;  %3927 = vmatprep.subr.mxu0 %v4180_v3  ;;  %v2185_v21 = vld [vmem:[%s5585_s5 + $0x308] sm:$0xff] }
 0x1eb   :  { %3948 = vmatprep.subr.mxu1 %v4180_v3  ;;  %3928 = vmatpush3.msra.mxu0 %v1695_v22  ;;  %v2266_v22 = vld [vmem:[%s5585_s5 + $0x340] sm:$0xff] }
 0x1ec   :  { %3949 = vmatpush3.msra.mxu1 %v1776_v23  ;;  %3929 = vmatprep.subr.mxu0 %v4180_v3  ;;  %v2274_v23 = vrot.slane %v4709_v44, 2 }
 0x1ed   :  { %3950 = vmatprep.subr.mxu1 %v4180_v3  ;;  %3930 = vmatpush3.msra.mxu0 %v1694_v24  ;;  %v2184_v24 = vld [vmem:[%s5585_s5 + $0x300] sm:$0xff] }
 0x1ee   :  { %3951 = vmatpush3.msra.mxu1 %v1775_v25  ;;  %3931 = vmatprep.subr.mxu0 %v4180_v3  ;;  %v2437_v25 = vld [vmem:[%s5585_s5 + $0x3f8] sm:$0xff] }
 0x1ef   :  { %3952 = vmatprep.subr.mxu1 %v4180_v3  ;;  %3932 = vmatpush3.msra.mxu0 %v1693_v26  ;;  %v2355_v26 = vld [vmem:[%s5585_s5 + $0x3b8] sm:$0xff] }
 0x1f0   :  { %3953 = vmatpush3.msra.mxu1 %v1774_v27  ;;  %3954 = vmatprep.mubr.msk.f32.mxu1 %vm4182_vm1, %v4180_v3  ;;  %v2436_v27 = vld [vmem:[%s5585_s5 + $0x3f0] sm:$0xff] }
 0x1f1   :  { %3933 = vmatprep.subr.mxu0 %v4180_v3  ;;  %3955 = vmatmul.mubr.msk.f32.vlgmr.msra.gmra.mxu1 %vm1219_vm2, %v1782_v28  ;;  %v2354_v28 = vld [vmem:[%s5585_s5 + $0x3b0] sm:$0xff] }
 0x1f2   :  { %3976 = vmatprep.subr.mxu1 %v4180_v3  ;;  %3934 = vmatpush3.msra.mxu0 %v1692_v29  ;;  %v2435_v29 = vld [vmem:[%s5585_s5 + $0x3e8] sm:$0xff] }
 0x1f3   :  { %3935 = vmatprep.mubr.msk.f32.mxu0 %vm4182_vm1, %v4180_v3  ;;  %3977 = vmatpush3.msra.mxu1 %v1945_v30  ;;  %v2353_v30 = vld [vmem:[%s5585_s5 + $0x3a8] sm:$0xff] }
 0x1f4   :  { %3936 = vmatmul.mubr.msk.f32.vlgmr.msra.gmra.mxu0 %vm1219_vm2, %v1700_v32  ;;  %3957 = vmatprep.subr.mxu0 %v4180_v3  ;;  %v2434_v32 = vld [vmem:[%s5585_s5 + $0x3e0] sm:$0xff] }
 0x1f5   :  { %3978 = vmatprep.subr.mxu1 %v4180_v3  ;;  %3958 = vmatpush3.msra.mxu0 %v1863_v33  ;;  %v2352_v33 = vld [vmem:[%s5585_s5 + $0x3a0] sm:$0xff] }
 0x1f6   :  { %3979 = vmatpush3.msra.mxu1 %v1944_v34  ;;  %3959 = vmatprep.subr.mxu0 %v4180_v3  ;;  %v2433_v34 = vld [vmem:[%s5585_s5 + $0x3d8] sm:$0xff] }
 0x1f7   :  { %3980 = vmatprep.subr.mxu1 %v4180_v3  ;;  %3960 = vmatpush3.msra.mxu0 %v1862_v35  ;;  %v2351_v35 = vld [vmem:[%s5585_s5 + $0x398] sm:$0xff] }
 0x1f8   :  { %3981 = vmatpush3.msra.mxu1 %v1943_v40  ;;  %3961 = vmatprep.subr.mxu0 %v4180_v3  ;;  %v2432_v40 = vld [vmem:[%s5585_s5 + $0x3d0] sm:$0xff] }
 0x1f9   :  { %3982 = vmatprep.subr.mxu1 %v4180_v3  ;;  %3962 = vmatpush3.msra.mxu0 %v1861_v41  ;;  %v2350_v41 = vld [vmem:[%s5585_s5 + $0x390] sm:$0xff] }
 0x1fa   :  { %3983 = vmatpush3.msra.mxu1 %v1942_v42  ;;  %3963 = vmatprep.subr.mxu0 %v4180_v3  ;;  %v2431_v42 = vld [vmem:[%s5585_s5 + $0x3c8] sm:$0xff] }
 0x1fb   :  { %3984 = vmatprep.subr.mxu1 %v4180_v3  ;;  %3964 = vmatpush3.msra.mxu0 %v1860_v43  ;;  %v2349_v43 = vld [vmem:[%s5585_s5 + $0x388] sm:$0xff] }
 0x1fc   :  { %3985 = vmatpush3.msra.mxu1 %v1941_v45  ;;  %3965 = vmatprep.subr.mxu0 %v4180_v3  ;;  %v2430_v45 = vld [vmem:[%s5585_s5 + $0x3c0] sm:$0xff] }
 0x1fd   :  { %3986 = vmatprep.subr.mxu1 %v4180_v3  ;;  %3966 = vmatpush3.msra.mxu0 %v1859_v48  ;;  %v2438_v48 = vrot.slane %v4709_v44, 6 }
 0x1fe   :  { %3987 = vmatpush3.msra.mxu1 %v1940_v49  ;;  %3967 = vmatprep.subr.mxu0 %v4180_v3  ;;  %v2348_v49 = vld [vmem:[%s5585_s5 + $0x380] sm:$0xff] }
 0x1ff   :  { %3988 = vmatprep.subr.mxu1 %v4180_v3  ;;  %3968 = vmatpush3.msra.mxu0 %v1858_v50  ;;  %v2356_v50 = vrot.slane %v4709_v44, 4 }
 0x200   :  { %3989 = vmatpush3.msra.mxu1 %v1939_v51  ;;  %3969 = vmatprep.subr.mxu0 %v4180_v3  ;;  %v2569_v51 = vld [vmem:[%s5587_s6 + $0x1c8] sm:$0xff] }
 0x201   :  { %3990 = vmatprep.subr.mxu1 %v4180_v3  ;;  %3970 = vmatpush3.msra.mxu0 %v1857_v53  ;;  %v2571_v53 = vld [vmem:[%s5587_s6 + $0x1d8] sm:$0xff] }
 0x202   :  { %3991 = vmatpush3.msra.mxu1 %v1938_v54  ;;  %3992 = vmatprep.mubr.msk.f32.mxu1 %vm4182_vm1, %v4180_v3  ;;  %v2568_v54 = vld [vmem:[%s5587_s6 + $0x1c0] sm:$0xff] }
 0x203   :  { %3971 = vmatprep.subr.mxu0 %v4180_v3  ;;  %3993 = vmatmul.mubr.msk.f32.vlgmr.msra.gmra.mxu1 %vm1219_vm2, %v1946_v55  ;;  %v2570_v55 = vld [vmem:[%s5587_s6 + $0x1d0] sm:$0xff] }
 0x204   :  { %4014 = vmatprep.subr.mxu1 %v4180_v3  ;;  %3972 = vmatpush3.msra.mxu0 %v1856_v57  ;;  %v2561_v57 = vld [vmem:[%s5587_s6 + $0x188] sm:$0xff] }
 0x205   :  { %3973 = vmatprep.mubr.msk.f32.mxu0 %vm4182_vm1, %v4180_v3  ;;  %4015 = vmatpush3.msra.mxu1 %v2109_v36  ;;  %v2563_v36 = vld [vmem:[%s5587_s6 + $0x198] sm:$0xff] }
 0x206   :  { %3974 = vmatmul.mubr.msk.f32.vlgmr.msra.gmra.mxu0 %vm1219_vm2, %v4688_v31  ;;  %3995 = vmatprep.subr.mxu0 %v4180_v3 }
 0x207   :  { %4016 = vmatprep.subr.mxu1 %v4180_v3  ;;  %3996 = vmatpush3.msra.mxu0 %v2027_v37  ;;  %v2560_v37 = vld [vmem:[%s5587_s6 + $0x180] sm:$0xff] }
 0x208   :  { %4017 = vmatpush3.msra.mxu1 %v2108_v38  ;;  %3997 = vmatprep.subr.mxu0 %v4180_v3  ;;  %v2562_v38 = vld [vmem:[%s5587_s6 + $0x190] sm:$0xff] }
 0x209   :  { %4018 = vmatprep.subr.mxu1 %v4180_v3  ;;  %3998 = vmatpush3.msra.mxu0 %v2026_v39  ;;  %v2553_v39 = vld [vmem:[%s5587_s6 + $0x148] sm:$0xff] }
 0x20a   :  { %4019 = vmatpush3.msra.mxu1 %v2107_v56  ;;  %3999 = vmatprep.subr.mxu0 %v4180_v3  ;;  %v2555_v56 = vld [vmem:[%s5587_s6 + $0x158] sm:$0xff] }
 0x20b   :  { %4020 = vmatprep.subr.mxu1 %v4180_v3  ;;  %4000 = vmatpush3.msra.mxu0 %v2025_v59  ;;  %v2552_v59 = vld [vmem:[%s5587_s6 + $0x140] sm:$0xff] }
 0x20c   :  { %4021 = vmatpush3.msra.mxu1 %v2106_v46  ;;  %4001 = vmatprep.subr.mxu0 %v4180_v3  ;;  %v2554_v46 = vld [vmem:[%s5587_s6 + $0x150] sm:$0xff] }
 0x20d   :  { %4022 = vmatprep.subr.mxu1 %v4180_v3  ;;  %4002 = vmatpush3.msra.mxu0 %v2024_v60  ;;  %v2545_v60 = vld [vmem:[%s5587_s6 + $0x108] sm:$0xff] }
 0x20e   :  { %4023 = vmatpush3.msra.mxu1 %v2105_v61  ;;  %4003 = vmatprep.subr.mxu0 %v4180_v3  ;;  %v2547_v61 = vld [vmem:[%s5587_s6 + $0x118] sm:$0xff] }
 0x20f   :  { %4024 = vmatprep.subr.mxu1 %v4180_v3  ;;  %4004 = vmatpush3.msra.mxu0 %v2023_v52  ;;  %v2544_v52 = vld [vmem:[%s5587_s6 + $0x100] sm:$0xff] }
 0x210   :  { %4025 = vmatpush3.msra.mxu1 %v2104_v47  ;;  %4005 = vmatprep.subr.mxu0 %v4180_v3  ;;  %v2546_v47 = vld [vmem:[%s5587_s6 + $0x110] sm:$0xff] }
 0x211   :  { %4026 = vmatprep.subr.mxu1 %v4180_v3  ;;  %4006 = vmatpush3.msra.mxu0 %v2022_v62  ;;  %v2537_v62 = vld [vmem:[%s5587_s6 + $0xc8] sm:$0xff] }
 0x212   :  { %4027 = vmatpush3.msra.mxu1 %v2103_v63  ;;  %4007 = vmatprep.subr.mxu0 %v4180_v3  ;;  %v2539_v63 = vld [vmem:[%s5587_s6 + $0xd8] sm:$0xff] }
 0x213   :  { %4028 = vmatprep.subr.mxu1 %v4180_v3  ;;  %4008 = vmatpush3.msra.mxu0 %v2021_v0  ;;  %v2536_v0 = vld [vmem:[%s5587_s6 + $0xc0] sm:$0xff] }
 0x214   :  { %4029 = vmatpush3.msra.mxu1 %v2102_v1  ;;  %4030 = vmatprep.mubr.msk.f32.mxu1 %vm4182_vm1, %v4180_v3  ;;  %v2538_v1 = vld [vmem:[%s5587_s6 + $0xd0] sm:$0xff] }
 0x215   :  { %4009 = vmatprep.subr.mxu0 %v4180_v3  ;;  %4031 = vmatmul.mubr.msk.f32.vlgmr.msra.gmra.mxu1 %vm1219_vm2, %v2110_v2  ;;  %v2529_v2 = vld [vmem:[%s5587_s6 + $0x88] sm:$0xff] }
 0x216   :  { %4052 = vmatprep.subr.mxu1 %v4180_v3  ;;  %4010 = vmatpush3.msra.mxu0 %v2020_v4  ;;  %v2531_v4 = vld [vmem:[%s5587_s6 + $0x98] sm:$0xff] }
 0x217   :  { %4011 = vmatprep.mubr.msk.f32.mxu0 %vm4182_vm1, %v4180_v3  ;;  %4053 = vmatpush3.msra.mxu1 %v2273_v5  ;;  %v2528_v5 = vld [vmem:[%s5587_s6 + $0x80] sm:$0xff] }
 0x218   :  { %4012 = vmatmul.mubr.msk.f32.vlgmr.msra.gmra.mxu0 %vm1219_vm2, %v2028_v7  ;;  %4033 = vmatprep.subr.mxu0 %v4180_v3  ;;  %v2530_v7 = vld [vmem:[%s5587_s6 + $0x90] sm:$0xff] }
 0x219   :  { %4054 = vmatprep.subr.mxu1 %v4180_v3  ;;  %4034 = vmatpush3.msra.mxu0 %v2191_v8  ;;  %v2521_v8 = vld [vmem:[%s5587_s6 + $0x48] sm:$0xff] }
 0x21a   :  { %4055 = vmatpush3.msra.mxu1 %v2272_v10  ;;  %4035 = vmatprep.subr.mxu0 %v4180_v3  ;;  %v2523_v10 = vld [vmem:[%s5587_s6 + $0x58] sm:$0xff] }
 0x21b   :  { %4056 = vmatprep.subr.mxu1 %v4180_v3  ;;  %4036 = vmatpush3.msra.mxu0 %v2190_v11  ;;  %v2520_v11 = vld [vmem:[%s5587_s6 + $0x40] sm:$0xff] }
 0x21c   :  { %4057 = vmatpush3.msra.mxu1 %v2271_v12  ;;  %4037 = vmatprep.subr.mxu0 %v4180_v3  ;;  %v2522_v12 = vld [vmem:[%s5587_s6 + $0x50] sm:$0xff] }
 0x21d   :  { %4058 = vmatprep.subr.mxu1 %v4180_v3  ;;  %4038 = vmatpush3.msra.mxu0 %v2189_v13  ;;  %v2513_v13 = vld [vmem:[%s5587_s6 + $0x8] sm:$0xff] }
 0x21e   :  { %4059 = vmatpush3.msra.mxu1 %v2270_v14  ;;  %4039 = vmatprep.subr.mxu0 %v4180_v3  ;;  %v2515_v14 = vld [vmem:[%s5587_s6 + $0x18] sm:$0xff] }
 0x21f   :  { %4060 = vmatprep.subr.mxu1 %v4180_v3  ;;  %4040 = vmatpush3.msra.mxu0 %v2188_v18 }
 0x220   :  { %4061 = vmatpush3.msra.mxu1 %v2269_v16  ;;  %4041 = vmatprep.subr.mxu0 %v4180_v3  ;;  %v2512_v16 = vld [vmem:[%s5587_s6] sm:$0xff] }
 0x221   :  { %4062 = vmatprep.subr.mxu1 %v4180_v3  ;;  %4042 = vmatpush3.msra.mxu0 %v2187_v19  ;;  %v2514_v19 = vld [vmem:[%s5587_s6 + $0x10] sm:$0xff] }
 0x222   :  { %4063 = vmatpush3.msra.mxu1 %v2268_v58  ;;  %4043 = vmatprep.subr.mxu0 %v4180_v3  ;;  %v2573_v58 = vld [vmem:[%s5587_s6 + $0x1e8] sm:$0xff] }
 0x223   :  { %4064 = vmatprep.subr.mxu1 %v4180_v3  ;;  %4044 = vmatpush3.msra.mxu0 %v2186_v17  ;;  %v2575_v17 = vld [vmem:[%s5587_s6 + $0x1f8] sm:$0xff] }
 0x224   :  { %4065 = vmatpush3.msra.mxu1 %v2267_v20  ;;  %4045 = vmatprep.subr.mxu0 %v4180_v3 }
 0x225   :  { %4066 = vmatprep.subr.mxu1 %v4180_v3  ;;  %4046 = vmatpush3.msra.mxu0 %v2185_v21 }
 0x226   :  { %4067 = vmatpush3.msra.mxu1 %v2266_v22  ;;  %4068 = vmatprep.mubr.msk.f32.mxu1 %vm4182_vm1, %v4180_v3 }
 0x227   :  { %4047 = vmatprep.subr.mxu0 %v4180_v3  ;;  %4069 = vmatmul.mubr.msk.f32.vlgmr.msra.gmra.mxu1 %vm1219_vm2, %v2274_v23 }
 0x228   :  { %4090 = vmatprep.subr.mxu1 %v4180_v3  ;;  %4048 = vmatpush3.msra.mxu0 %v2184_v24 }
 0x229   :  { %4049 = vmatprep.mubr.msk.f32.mxu0 %vm4182_vm1, %v4180_v3  ;;  %4091 = vmatpush3.msra.mxu1 %v2437_v25 }
 0x22a   :  { %4050 = vmatmul.mubr.msk.f32.vlgmr.msra.gmra.mxu0 %vm1219_vm2, %v4709_v44  ;;  %4071 = vmatprep.subr.mxu0 %v4180_v3 }
 0x22b   :  { %4092 = vmatprep.subr.mxu1 %v4180_v3  ;;  %4072 = vmatpush3.msra.mxu0 %v2355_v26 }
 0x22c   :  { %4093 = vmatpush3.msra.mxu1 %v2436_v27  ;;  %4073 = vmatprep.subr.mxu0 %v4180_v3 }
 0x22d   :  { %4094 = vmatprep.subr.mxu1 %v4180_v3  ;;  %4074 = vmatpush3.msra.mxu0 %v2354_v28 }
 0x22e   :  { %4095 = vmatpush3.msra.mxu1 %v2435_v29  ;;  %4075 = vmatprep.subr.mxu0 %v4180_v3 }
 0x22f   :  { %4096 = vmatprep.subr.mxu1 %v4180_v3  ;;  %4076 = vmatpush3.msra.mxu0 %v2353_v30 }
 0x230   :  { %4097 = vmatpush3.msra.mxu1 %v2434_v32  ;;  %4077 = vmatprep.subr.mxu0 %v4180_v3 }
 0x231   :  { %4098 = vmatprep.subr.mxu1 %v4180_v3  ;;  %4078 = vmatpush3.msra.mxu0 %v2352_v33 }
 0x232   :  { %4099 = vmatpush3.msra.mxu1 %v2433_v34  ;;  %4079 = vmatprep.subr.mxu0 %v4180_v3 }
 0x233   :  { %4100 = vmatprep.subr.mxu1 %v4180_v3  ;;  %4080 = vmatpush3.msra.mxu0 %v2351_v35 }
 0x234   :  { %4101 = vmatpush3.msra.mxu1 %v2432_v40  ;;  %4081 = vmatprep.subr.mxu0 %v4180_v3 }
 0x235   :  { %4102 = vmatprep.subr.mxu1 %v4180_v3  ;;  %4082 = vmatpush3.msra.mxu0 %v2350_v41 }
 0x236   :  { %4103 = vmatpush3.msra.mxu1 %v2431_v42  ;;  %4083 = vmatprep.subr.mxu0 %v4180_v3 }
 0x237   :  { %4104 = vmatprep.subr.mxu1 %v4180_v3  ;;  %4084 = vmatpush3.msra.mxu0 %v2349_v43 }
 0x238   :  { %4105 = vmatpush3.msra.mxu1 %v2430_v45  ;;  %4106 = vmatprep.mubr.msk.f32.mxu1 %vm4182_vm1, %v4180_v3 }
 0x239   :  { %4085 = vmatprep.subr.mxu0 %v4180_v3  ;;  %4107 = vmatmul.mubr.msk.f32.vlgmr.msra.gmra.mxu1 %vm1219_vm2, %v2438_v48 }
 0x23a   :  { %4086 = vmatpush3.msra.mxu0 %v2348_v49  ;;  %4087 = vmatprep.mubr.msk.f32.mxu0 %vm4182_vm1, %v4180_v3 }
 0x23b   :  { %4088 = vmatmul.mubr.msk.f32.vlgmr.msra.gmra.mxu0 %vm1219_vm2, %v2356_v50  ;;  %2714 = vmatprep.mubr.f32.mxu1 %v4180_v3 }
 0x23c   :  { %2643 = vmatprep.mubr.f32.mxu0 %v4180_v3  ;;  %2595 = vmatprep.subr.mxu0 %v2569_v51 }
 0x23d   :  { %2666 = vmatprep.subr.mxu1 %v2571_v53  ;;  %2596 = vmatpush1.msra.mxu0 %v2568_v54 }
 0x23e   :  { %2667 = vmatpush1.msra.mxu1 %v2570_v55  ;;  %2597 = vmatprep.subr.mxu0 %v2561_v57 }
 0x23f   :  { %2668 = vmatprep.subr.mxu1 %v2563_v36  ;;  %2598 = vmatpush1.msra.mxu0 %v2560_v37 }
 0x240   :  { %2669 = vmatpush1.msra.mxu1 %v2562_v38  ;;  %2599 = vmatprep.subr.mxu0 %v2553_v39 }
 0x241   :  { %2670 = vmatprep.subr.mxu1 %v2555_v56  ;;  %2600 = vmatpush1.msra.mxu0 %v2552_v59 }
 0x242   :  { %2671 = vmatpush1.msra.mxu1 %v2554_v46  ;;  %2601 = vmatprep.subr.mxu0 %v2545_v60 }
 0x243   :  { %2672 = vmatprep.subr.mxu1 %v2547_v61  ;;  %2602 = vmatpush1.msra.mxu0 %v2544_v52 }
 0x244   :  { %2673 = vmatpush1.msra.mxu1 %v2546_v47  ;;  %2603 = vmatprep.subr.mxu0 %v2537_v62 }
 0x245   :  { %2674 = vmatprep.subr.mxu1 %v2539_v63  ;;  %2604 = vmatpush1.msra.mxu0 %v2536_v0 }
 0x246   :  { %2675 = vmatpush1.msra.mxu1 %v2538_v1  ;;  %2605 = vmatprep.subr.mxu0 %v2529_v2 }
 0x247   :  { %2676 = vmatprep.subr.mxu1 %v2531_v4  ;;  %2606 = vmatpush1.msra.mxu0 %v2528_v5 }
 0x248   :  { %2677 = vmatpush1.msra.mxu1 %v2530_v7  ;;  %2607 = vmatprep.subr.mxu0 %v2521_v8  ;;  %v2572_v7 = vld [vmem:[%s5587_s6 + $0x1e0] sm:$0xff]  ;;  %v2574_v8 = vld [vmem:[%s5587_s6 + $0x1f0] sm:$0xff] }
 0x249   :  { %2678 = vmatprep.subr.mxu1 %v2523_v10  ;;  %2608 = vmatpush1.msra.mxu0 %v2520_v11  ;;  %v2565_v10 = vld [vmem:[%s5587_s6 + $0x1a8] sm:$0xff]  ;;  %v2567_v11 = vld [vmem:[%s5587_s6 + $0x1b8] sm:$0xff] }
 0x24a   :  { %2679 = vmatpush1.msra.mxu1 %v2522_v12  ;;  %2609 = vmatprep.subr.mxu0 %v2513_v13  ;;  %v2564_v12 = vld [vmem:[%s5587_s6 + $0x1a0] sm:$0xff]  ;;  %v2566_v13 = vld [vmem:[%s5587_s6 + $0x1b0] sm:$0xff] }
 0x24b   :  { %2680 = vmatprep.subr.mxu1 %v2515_v14  ;;  %2610 = vmatpush1.msra.mxu0 %v2512_v16  ;;  %v2557_v14 = vld [vmem:[%s5587_s6 + $0x168] sm:$0xff]  ;;  %v2556_v16 = vld [vmem:[%s5587_s6 + $0x160] sm:$0xff] }
 0x24c   :  { %2681 = vmatpush1.msra.mxu1 %v2514_v19  ;;  %2737 = vmatprep.subr.mxu0 %v2573_v58  ;;  %v2558_v19 = vld [vmem:[%s5587_s6 + $0x170] sm:$0xff]  ;;  %v2549_v58 = vld [vmem:[%s5587_s6 + $0x128] sm:$0xff] }
 0x24d   :  { %2808 = vmatprep.subr.mxu1 %v2575_v17  ;;  %v2551_v17 = vld [vmem:[%s5587_s6 + $0x138] sm:$0xff] }
 0x27d   :  { %v1360_v18 = vpop.f32.mrf.mxu1 }
 0x27f   :  { %v1288_v20 = vpop.f32.mrf.mxu0  ;;  %v3842_v21 = vpop.f32.mrf.mxu1 }
 0x280   :  { %v1361_v22 = vadd.f32 %v1360_v18, %v1288_v20  ;;  %v2559_v18 = vld [vmem:[%s5587_s6 + $0x178] sm:$0xff]  ;;  %v2548_v20 = vld [vmem:[%s5587_s6 + $0x120] sm:$0xff]  ;;  %v2550_v21 = vld [vmem:[%s5587_s6 + $0x130] sm:$0xff] }
 0x281   :  { %v3823_v23 = vpop.f32.mrf.mxu0 }
 0x282   :  { %v2543_v23 = vld [vmem:[%s5587_s6 + $0xf8] sm:$0xff] }
 0x28d   :  { %v1523_v24 = vpop.f32.mrf.mxu1 }
 0x28f   :  { %v3880_v25 = vpop.f32.mrf.mxu1 }
 0x290   :  { %v1441_v26 = vpop.f32.mrf.mxu0  ;;  %v2542_v25 = vld [vmem:[%s5587_s6 + $0xf0] sm:$0xff] }
 0x291   :  { %v1445_v27 = vadd.f32 %v1441_v26, %v1361_v22  ;;  %v2541_v22 = vld [vmem:[%s5587_s6 + $0xe8] sm:$0xff] }
 0x292   :  { %v3861_v28 = vpop.f32.mrf.mxu0  ;;  %v2533_v26 = vld [vmem:[%s5587_s6 + $0xa8] sm:$0xff] }
 0x293   :  { %v1527_v29 = vadd.f32 %v1523_v24, %v1445_v27  ;;  %v2540_v24 = vld [vmem:[%s5587_s6 + $0xe0] sm:$0xff]  ;;  %v2535_v27 = vld [vmem:[%s5587_s6 + $0xb8] sm:$0xff] }
 0x294   :  { %v2532_v28 = vld [vmem:[%s5587_s6 + $0xa0] sm:$0xff] }
 0x29f   :  { %v1687_v30 = vpop.f32.mrf.mxu1 }
 0x2a1   :  { %v3918_v32 = vpop.f32.mrf.mxu1 }
 0x2a2   :  { %v1605_v33 = vpop.f32.mrf.mxu0  ;;  %v2527_v32 = vld [vmem:[%s5587_s6 + $0x78] sm:$0xff] }
 0x2a3   :  { %v1609_v34 = vadd.f32 %v1605_v33, %v1527_v29  ;;  %v2534_v29 = vld [vmem:[%s5587_s6 + $0xb0] sm:$0xff]  ;;  %v2524_v33 = vld [vmem:[%s5587_s6 + $0x60] sm:$0xff] }
 0x2a4   :  { %v3899_v35 = vpop.f32.mrf.mxu0 }
 0x2a5   :  { %v1691_v40 = vadd.f32 %v1687_v30, %v1609_v34  ;;  %v2525_v30 = vld [vmem:[%s5587_s6 + $0x68] sm:$0xff]  ;;  %v2526_v34 = vld [vmem:[%s5587_s6 + $0x70] sm:$0xff] }
 0x2a6   :  { %v2517_v35 = vld [vmem:[%s5587_s6 + $0x28] sm:$0xff] }
 0x2b1   :  { %v1851_v41 = vpop.f32.mrf.mxu1 }
 0x2b3   :  { %v3956_v42 = vpop.f32.mrf.mxu1 }
 0x2b4   :  { %v1769_v43 = vpop.f32.mrf.mxu0  ;;  %v2518_v42 = vld [vmem:[%s5587_s6 + $0x30] sm:$0xff] }
 0x2b5   :  { %v1773_v36 = vadd.f32 %v1769_v43, %v1691_v40  ;;  %v2519_v40 = vld [vmem:[%s5587_s6 + $0x38] sm:$0xff] }
 0x2b6   :  { %v3937_v45 = vpop.f32.mrf.mxu0 }
 0x2b7   :  { %v1855_v38 = vadd.f32 %v1851_v41, %v1773_v36  ;;  %v2516_v41 = vld [vmem:[%s5587_s6 + $0x20] sm:$0xff]  ;;  %s4183_s6 = smov 64  }
 0x2c3   :  { %v2015_v48 = vpop.f32.mrf.mxu1 }
 0x2c5   :  { %v3994_v49 = vpop.f32.mrf.mxu1 }
 0x2c6   :  { %v1933_v50 = vpop.f32.mrf.mxu0 }
 0x2c7   :  { %v1937_v56 = vadd.f32 %v1933_v50, %v1855_v38 }
 0x2c8   :  { %v3975_v51 = vpop.f32.mrf.mxu0 }
 0x2c9   :  { %v2019_v60 = vadd.f32 %v2015_v48, %v1937_v56 }
 0x2d5   :  { %v2179_v53 = vpop.f32.mrf.mxu1 }
 0x2d7   :  { %v4032_v54 = vpop.f32.mrf.mxu1 }
 0x2d8   :  { %v2097_v55 = vpop.f32.mrf.mxu0  ;;  %v3024_v54 = vld [vmem:[%s5588_s7 + $0xc0] sm:$0xff] }
 0x2d9   :  { %v2101_v61 = vadd.f32 %v2097_v55, %v2019_v60  ;;  %v3028_v55 = vld [vmem:[%s5588_s7 + $0xe0] sm:$0xff]  ;;  %v3017_v60 = vld [vmem:[%s5588_s7 + $0x88] sm:$0xff] }
 0x2da   :  { %v4013_v57 = vpop.f32.mrf.mxu0  ;;  %v3538_v36 = vcombine.high %v3024_v54, %v3028_v55  ;;  %v3537_v38 = vcombine.low %v3024_v54, %v3028_v55 }
 0x2db   :  { %v2183_v52 = vadd.f32 %v2179_v53, %v2101_v61  ;;  %v3025_v57 = vld [vmem:[%s5588_s7 + $0xc8] sm:$0xff] }
 0x2e7   :  { %v2343_v37 = vpop.f32.mrf.mxu1 }
 0x2e9   :  { %v4070_v39 = vpop.f32.mrf.mxu1 }
 0x2ea   :  { %v2261_v59 = vpop.f32.mrf.mxu0 }
 0x2eb   :  { %v2265_v47 = vadd.f32 %v2261_v59, %v2183_v52  ;;  %v3016_v59 = vld [vmem:[%s5588_s7 + $0x80] sm:$0xff]  ;;  %v3021_v52 = vld [vmem:[%s5588_s7 + $0xa8] sm:$0xff] }
 0x2ec   :  { %v4051_v46 = vpop.f32.mrf.mxu0 }
 0x2ed   :  { %v2347_v63 = vadd.f32 %v2343_v37, %v2265_v47  ;;  %v3029_v37 = vld [vmem:[%s5588_s7 + $0xe8] sm:$0xff]  ;;  %v3020_v46 = vld [vmem:[%s5588_s7 + $0xa0] sm:$0xff] }
 0x2ee   :  { %v3539_v39 = vcombine.low %v3025_v57, %v3029_v37  ;;  %v3540_v56 = vcombine.high %v3025_v57, %v3029_v37  ;;  %v3530_v61 = vcombine.high %v3016_v59, %v3020_v46 }
 0x2f9   :  { %v2507_v62 = vpop.f32.mrf.mxu1 }
 0x2fb   :  { %v2425_v0 = vpop.f32.mrf.mxu0  ;;  %v4108_v1 = vpop.f32.mrf.mxu1 }
 0x2fc   :  { %v2429_v2 = vadd.f32 %v2425_v0, %v2347_v63  ;;  %v3529_v63 = vcombine.low %v3016_v59, %v3020_v46  ;;  %v3531_v0 = vcombine.low %v3017_v60, %v3021_v52  ;;  %v3532_v1 = vcombine.high %v3017_v60, %v3021_v52 }
 0x2fd   :  { %v4089_v4 = vpop.f32.mrf.mxu0 }
 0x2fe   :  { %v5288_v5 = vadd.f32 %v2507_v62, %v2429_v2 }
 0x300   :  { %3509 = vmatmul.mubr.msk.f32.vlgmr.msra.gmra.mxu0 %vm1219_vm2, %v5288_v5  ;;  %3510 = vmatmul.mubr.msk.f32.vlgmr.msra.gmra.mxu1 %vm1219_vm2, %v5288_v5 }
 0x301   :  { %2738 = vmatpush1.msra.mxu0 %v2572_v7  ;;  %2809 = vmatpush1.msra.mxu1 %v2574_v8  ;;  %v3012_v7 = vld [vmem:[%s5588_s7 + $0x60] sm:$0xff]  ;;  %v3009_v8 = vld [vmem:[%s5588_s7 + $0x48] sm:$0xff] }
 0x302   :  { %2739 = vmatprep.subr.mxu0 %v2565_v10  ;;  %2810 = vmatprep.subr.mxu1 %v2567_v11  ;;  %v3013_v11 = vld [vmem:[%s5588_s7 + $0x68] sm:$0xff] }
 0x303   :  { %2740 = vmatpush1.msra.mxu0 %v2564_v12  ;;  %2811 = vmatpush1.msra.mxu1 %v2566_v13 }
 0x304   :  { %2741 = vmatprep.subr.mxu0 %v2557_v14  ;;  %2812 = vmatprep.subr.mxu1 %v2559_v18  ;;  %v3000_v18 = vld [vmem:[%s5588_s7] sm:$0xff] }
 0x305   :  { %2742 = vmatpush1.msra.mxu0 %v2556_v16  ;;  %2813 = vmatpush1.msra.mxu1 %v2558_v19  ;;  %v3004_v16 = vld [vmem:[%s5588_s7 + $0x20] sm:$0xff]  ;;  %v3001_v19 = vld [vmem:[%s5588_s7 + $0x8] sm:$0xff] }
 0x306   :  { %2743 = vmatprep.subr.mxu0 %v2549_v58  ;;  %2814 = vmatprep.subr.mxu1 %v2551_v17  ;;  %v3523_v17 = vcombine.low %v3009_v8, %v3013_v11 }
 0x307   :  { %2744 = vmatpush1.msra.mxu0 %v2548_v20  ;;  %2815 = vmatpush1.msra.mxu1 %v2550_v21  ;;  %v3524_v20 = vcombine.high %v3009_v8, %v3013_v11  ;;  %v3005_v21 = vld [vmem:[%s5588_s7 + $0x28] sm:$0xff] }
 0x308   :  { %2745 = vmatprep.subr.mxu0 %v2541_v22  ;;  %2816 = vmatprep.subr.mxu1 %v2543_v23  ;;  %v5472_v22 = vld [vmem:[%s5588_s7 + $0xd0] sm:$0xff] }
 0x309   :  { %2746 = vmatpush1.msra.mxu0 %v2540_v24  ;;  %2817 = vmatpush1.msra.mxu1 %v2542_v25  ;;  %v5477_v23 = vld [vmem:[%s5588_s7 + $0xf0] sm:$0xff]  ;;  %v3514_v24 = vcombine.high %v3000_v18, %v3004_v16  ;;  %v3516_v25 = vcombine.high %v3001_v19, %v3005_v21 }
 0x30a   :  { %2747 = vmatprep.subr.mxu0 %v2533_v26  ;;  %2818 = vmatprep.subr.mxu1 %v2535_v27  ;;  %v5482_v26 = vld [vmem:[%s5588_s7 + $0xd8] sm:$0xff] }
 0x30b   :  { %2748 = vmatpush1.msra.mxu0 %v2532_v28  ;;  %2819 = vmatpush1.msra.mxu1 %v2534_v29  ;;  %v5487_v27 = vld [vmem:[%s5588_s7 + $0xf8] sm:$0xff]  ;;  %v3541_v29 = vcombine.low %v5472_v22, %v5477_v23 }
 0x30c   :  { %2749 = vmatprep.subr.mxu0 %v2525_v30  ;;  %2820 = vmatprep.subr.mxu1 %v2527_v32  ;;  %v3513_v30 = vcombine.low %v3000_v18, %v3004_v16  ;;  %v3515_v32 = vcombine.low %v3001_v19, %v3005_v21 }
 0x30d   :  { %2750 = vmatpush1.msra.mxu0 %v2524_v33  ;;  %2821 = vmatpush1.msra.mxu1 %v2526_v34  ;;  %v3543_v33 = vcombine.low %v5482_v26, %v5487_v27  ;;  %v3542_v34 = vcombine.high %v5472_v22, %v5477_v23  ;;  %v3003_v22 = vld [vmem:[%s5588_s7 + $0x18] sm:$0xff] }
 0x30e   :  { %2751 = vmatprep.subr.mxu0 %v2517_v35  ;;  %2822 = vmatprep.subr.mxu1 %v2519_v40  ;;  %v3544_v35 = vcombine.high %v5482_v26, %v5487_v27  ;;  %v3007_v23 = vld [vmem:[%s5588_s7 + $0x38] sm:$0xff] }
 0x30f   :  { %2752 = vmatpush1.msra.mxu0 %v2516_v41  ;;  %2785 = vmatprep.mubr.f32.mxu0 %v4180_v3 }
 0x310   :  { %2823 = vmatpush1.msra.mxu1 %v2518_v42  ;;  %2856 = vmatprep.mubr.f32.mxu1 %v4180_v3 }
 0x311   :  { %3511 = vmatmul.mubr.msk.f32.vlgmr.msra.gmra.mxu0 %vm1219_vm2, %v5288_v5  ;;  %3512 = vmatmul.mubr.msk.f32.vlgmr.msra.gmra.mxu1 %vm1219_vm2, %v5288_v5  ;;  %v3008_v5 = vld [vmem:[%s5588_s7 + $0x40] sm:$0xff] }
 0x312   :  { %3227 = vmatprep.mubr.bf16.mxu0 %v4181_v15  ;;  %3268 = vmatprep.mubr.bf16.mxu1 %v4181_v15  ;;  %v3521_v13 = vcombine.low %v3008_v5, %v3012_v7  ;;  %v3522_v14 = vcombine.high %v3008_v5, %v3012_v7 }
 0x313   :  { %3203 = vmatprep.subr.bf16.mxu0 %v3538_v36  ;;  %3244 = vmatprep.subr.bf16.mxu1 %v3540_v56 }
 0x314   :  { %3204 = vmatpush1.bf16.msra.mxu0 %v3537_v38  ;;  %3245 = vmatpush1.bf16.msra.mxu1 %v3539_v39 }
 0x315   :  { %3205 = vmatprep.subr.bf16.mxu0 %v3530_v61  ;;  %3246 = vmatprep.subr.bf16.mxu1 %v3532_v1 }
 0x318   :  { %3206 = vmatpush1.bf16.msra.mxu0 %v3529_v63  ;;  %3247 = vmatpush1.bf16.msra.mxu1 %v3531_v0 }
 0x319   :  { %3207 = vmatprep.subr.bf16.mxu0 %v3522_v14  ;;  %3248 = vmatprep.subr.bf16.mxu1 %v3524_v20 }
 0x31c   :  { %3208 = vmatpush1.bf16.msra.mxu0 %v3521_v13  ;;  %3249 = vmatpush1.bf16.msra.mxu1 %v3523_v17 }
 0x31d   :  { %3209 = vmatprep.subr.bf16.mxu0 %v3514_v24  ;;  %3250 = vmatprep.subr.bf16.mxu1 %v3516_v25 }
 0x320   :  { %3210 = vmatpush1.bf16.msra.mxu0 %v3513_v30  ;;  %3251 = vmatpush1.bf16.msra.mxu1 %v3515_v32 }
 0x321   :  { %3285 = vmatprep.subr.bf16.mxu0 %v3542_v34  ;;  %3326 = vmatprep.subr.bf16.mxu1 %v3544_v35 }
 0x3c0   :  { %v5392_v43 = vpop.f32.mrf.mxu0  ;;  %v5394_v45 = vpop.f32.mrf.mxu1 }
 0x3c1   :  { %v2866_v48 = vrot.slane %v5392_v43, 6  ;;  %v2899_v51 = vrot.slane %v5394_v45, 6  ;;  %v2895_v59 = vsub.f32 %v4796_v6, %v5394_v45 }
 0x3c2   :  { %v5397_v49 = vpop.f32.mrf.mxu0  ;;  %v5401_v50 = vpop.f32.mrf.mxu1 }
 0x3c3   :  { %v2885_v3 = vrot.slane %v5397_v49, 2  ;;  %2867 = vrot.lane.b32.xlu0 %v2866_v48, %s4183_s6  ;;  %v2918_v53 = vrot.slane %v5401_v50, 2  ;;  %v2877_v40 = vrot.slane %v5397_v49, 4  ;;  %v2863_v48 = vsub.f32 %v4653_v9, %v5392_v43 }
 0x3c4   :  { %v2910_v54 = vrot.slane %v5401_v50, 4 }
 0x3c5   :  { %2886 = vrot.lane.b32.xlu1 %v2885_v3, %s4183_s6  ;;  %v2879_v41 = vsub.f32 %v4653_v9, %v2877_v40  ;;  %v2864_v37 = vmul.f32 %v2863_v48, %v2863_v48 }
 0x3c6   :  { %v2912_v46 = vsub.f32 %v4796_v6, %v2910_v54 }
 0x3c7   :  { %2900 = vrot.lane.b32.xlu0 %v2899_v51, %s4183_s6 }
 0x3c8   :  { %v2913_v0 = vmul.f32 %v2912_v46, %v2912_v46 }
 0x3c9   :  { %2919 = vrot.lane.b32.xlu1 %v2918_v53, %s4183_s6  ;;  %v2880_v53 = vmul.f32 %v2879_v41, %v2879_v41 }
 0x3cb   :  { %v2882_v43 = vrot.slane %v2880_v53, 4 }
 0x3d1   :  { %v5432_v47 = vpop.f32.mrf.mxu0  ;;  %v5434_v62 = vpop.f32.mrf.mxu1 }
 0x3d2   :  { %v2932_v2 = vrot.slane %v5432_v47, 6  ;;  %v2965_v58 = vrot.slane %v5434_v62, 6  ;;  %v2928_v45 = vsub.f32 %v4688_v31, %v5432_v47  ;;  %v2961_v35 = vsub.f32 %v4709_v44, %v5434_v62  ;;  %v3018_v62 = vld [vmem:[%s5588_s7 + $0x90] sm:$0xff] }
 0x3d3   :  { %v5437_v4 = vpop.f32.mrf.mxu0  ;;  %v5453_v12 = vpop.f32.mrf.mxu1 }
 0x3d4   :  { %v2951_v10 = vrot.slane %v5437_v4, 2  ;;  %2933 = vrot.lane.b32.xlu0 %v2932_v2, %s4183_s6  ;;  %v2984_v28 = vrot.slane %v5453_v12, 2  ;;  %v2943_v2 = vrot.slane %v5437_v4, 4  ;;  %v2929_v19 = vmul.f32 %v2928_v45, %v2928_v45 }
 0x3d5   :  { %v2976_v4 = vrot.slane %v5453_v12, 4 }
 0x3d6   :  { %2952 = vrot.lane.b32.xlu1 %v2951_v10, %s4183_s6  ;;  %v2915_v10 = vrot.slane %v2913_v0, 4  ;;  %v2945_v13 = vsub.f32 %v4688_v31, %v2943_v2  ;;  %v3015_v0 = vld [vmem:[%s5588_s7 + $0x78] sm:$0xff] }
 0x3d7   :  { %v2978_v41 = vsub.f32 %v4709_v44, %v2976_v4 }
 0x3d8   :  { %2966 = vrot.lane.b32.xlu0 %v2965_v58, %s4183_s6  ;;  %v2946_v20 = vmul.f32 %v2945_v13, %v2945_v13  ;;  %v4184_v13 = vmov 1983009808  }
 0x3d9   :  { %v2979_v53 = vmul.f32 %v2978_v41, %v2978_v41 }
 0x3da   :  { %2985 = vrot.lane.b32.xlu1 %v2984_v28, %s4183_s6  ;;  %v2948_v40 = vrot.slane %v2946_v20, 4 }
 0x435   :  { %v2868_v42 = vpop.permute.xlu0 %2867 }
 0x436   :  { %v2870_v3 = vsub.f32 %v4653_v9, %v2868_v42 }
 0x437   :  { %v2887_v51 = vpop.permute.xlu1 %2886 }
 0x438   :  { %v2871_v55 = vmul.f32 %v2870_v3, %v2870_v3  ;;  %v2889_v57 = vsub.f32 %v4653_v9, %v2887_v51  ;;  %v2896_v9 = vmul.f32 %v2895_v59, %v2895_v59  ;;  %v3023_v59 = vld [vmem:[%s5588_s7 + $0xb8] sm:$0xff] }
 0x439   :  { %v2901_v36 = vpop.permute.xlu0 %2900 }
 0x43a   :  { %v2873_v38 = vrot.slane %v2871_v55, 2  ;;  %v2890_v39 = vmul.f32 %v2889_v57, %v2889_v57  ;;  %v2903_v49 = vsub.f32 %v4796_v6, %v2901_v36 }
 0x43b   :  { %v2920_v56 = vpop.permute.xlu1 %2919 }
 0x43c   :  { %v2875_v60 = vadd.f32 %v2873_v38, %v2864_v37  ;;  %v2892_v52 = vrot.slane %v2890_v39, 6  ;;  %v2904_v50 = vmul.f32 %v2903_v49, %v2903_v49  ;;  %v2922_v63 = vsub.f32 %v4796_v6, %v2920_v56  ;;  %v3022_v56 = vld [vmem:[%s5588_s7 + $0xb0] sm:$0xff] }
 0x43d   :  { %v2981_v37 = vrot.slane %v2979_v53, 4 }
 0x43e   :  { %v2884_v61 = vadd.f32 %v2882_v43, %v2875_v60  ;;  %v2906_v7 = vrot.slane %v2904_v50, 2  ;;  %v2923_v8 = vmul.f32 %v2922_v63, %v2922_v63  ;;  %v3010_v50 = vld [vmem:[%s5588_s7 + $0x50] sm:$0xff] }
 0x43f   :  { %v3014_v63 = vld [vmem:[%s5588_s7 + $0x70] sm:$0xff] }
 0x440   :  { %v2894_v1 = vadd.f32 %v2892_v52, %v2884_v61  ;;  %v2925_v18 = vrot.slane %v2923_v8, 6  ;;  %v3534_v61 = vcombine.high %v3018_v62, %v3022_v56  ;;  %v3002_v8 = vld [vmem:[%s5588_s7 + $0x10] sm:$0xff]  ;;  %v3525_v26 = vcombine.low %v3010_v50, %v3014_v63 }
 0x442   :  { %v2897_v5 = vadd.f32 %v2896_v9, %v2894_v1  ;;  %v3011_v9 = vld [vmem:[%s5588_s7 + $0x58] sm:$0xff]  ;;  %v3533_v1 = vcombine.low %v3018_v62, %v3022_v56 }
 0x443   :  { %v3527_v27 = vcombine.low %v3011_v9, %v3015_v0 }
 0x444   :  { %v2908_v11 = vadd.f32 %v2906_v7, %v2897_v5  ;;  %v3526_v5 = vcombine.high %v3010_v50, %v3014_v63  ;;  %v3528_v7 = vcombine.high %v3011_v9, %v3015_v0 }
 0x446   :  { %v2917_v14 = vadd.f32 %v2915_v10, %v2908_v11  ;;  %v2934_v16 = vpop.permute.xlu0 %2933  ;;  %v3006_v10 = vld [vmem:[%s5588_s7 + $0x30] sm:$0xff]  ;;  %v3519_v11 = vcombine.low %v3003_v22, %v3007_v23 }
 0x447   :  { %v2936_v6 = vsub.f32 %v4688_v31, %v2934_v16  ;;  %v3517_v45 = vcombine.low %v3002_v8, %v3006_v10 }
 0x448   :  { %v2927_v58 = vadd.f32 %v2925_v18, %v2917_v14  ;;  %v2953_v17 = vpop.permute.xlu1 %2952  ;;  %v3370_v14 = vunpack.c.l.s4 %v4184_v13  ;;  %v3372_v18 = vlaneseq }
 0x449   :  { %v2937_v21 = vmul.f32 %v2936_v6, %v2936_v6  ;;  %v2955_v24 = vsub.f32 %v4688_v31, %v2953_v17  ;;  %v2962_v31 = vmul.f32 %v2961_v35, %v2961_v35 }
 0x44a   :  { %v2930_v25 = vadd.f32 %v2929_v19, %v2927_v58  ;;  %v2967_v28 = vpop.permute.xlu0 %2966  ;;  %v3371_v16 = vunpack.c.0.s8 %v3370_v14  ;;  %v3373_v6 = vshrl.u32 %v3372_v18, 7 }
 0x44b   :  { %v2939_v47 = vrot.slane %v2937_v21, 2  ;;  %v2956_v30 = vmul.f32 %v2955_v24, %v2955_v24  ;;  %v2969_v32 = vsub.f32 %v4709_v44, %v2967_v28 }
 0x44c   :  { %v2986_v34 = vpop.permute.xlu1 %2985  ;;  %v3374_v17 = vsub.s32 %v3371_v16, %v3373_v6 }
 0x44d   :  { %v2941_v42 = vadd.f32 %v2939_v47, %v2930_v25  ;;  %v2958_v3 = vrot.slane %v2956_v30, 6  ;;  %v2970_v12 = vmul.f32 %v2969_v32, %v2969_v32  ;;  %v2988_v51 = vsub.f32 %v4709_v44, %v2986_v34  ;;  %v3019_v44 = vld [vmem:[%s5588_s7 + $0x98] sm:$0xff] }
 0x44e   :  { %v3536_v52 = vcombine.high %v3019_v44, %v3023_v59  ;;  %v3535_v2 = vcombine.low %v3019_v44, %v3023_v59 }
 0x44f   :  { %v2950_v48 = vadd.f32 %v2948_v40, %v2941_v42  ;;  %v2972_v57 = vrot.slane %v2970_v12, 2  ;;  %v2989_v36 = vmul.f32 %v2988_v51, %v2988_v51 }
 0x451   :  { %v2960_v54 = vadd.f32 %v2958_v3, %v2950_v48  ;;  %v2991_v39 = vrot.slane %v2989_v36, 6 }
 0x453   :  { %v2963_v55 = vadd.f32 %v2962_v31, %v2960_v54 }
 0x455   :  { %v2974_v38 = vadd.f32 %v2972_v57, %v2963_v55 }
 0x457   :  { %v2983_v49 = vadd.f32 %v2981_v37, %v2974_v38 }
 0x459   :  { %v2993_v43 = vadd.f32 %v2991_v39, %v2983_v49 }
 0x45b   :  { %v2995_v46 = vsel %vm2994_vm3, %v2993_v43, 0.0  ;;  %v2999_v60 = vpack.c.bf16 %v2993_v43, %v2993_v43 }
 0x45c   :  { %2996 = vadd.xlane.f32.xlu0 %v2995_v46 }
 0x45d   :  { %3545 = vmatmul.mubr.msk.bf16.vlgmr.msra.gmra.mxu0 %vm1219_vm2, %v2999_v60  ;;  %3546 = vmatmul.mubr.msk.bf16.vlgmr.msra.gmra.mxu1 %vm1219_vm2, %v2999_v60 }
 0x45e   :  { %3286 = vmatpush1.bf16.msra.mxu0 %v3541_v29  ;;  %3327 = vmatpush1.bf16.msra.mxu1 %v3543_v33  ;;  %v3518_v29 = vcombine.high %v3002_v8, %v3006_v10  ;;  %v3520_v33 = vcombine.high %v3003_v22, %v3007_v23 }
 0x45f   :  { %3287 = vmatprep.subr.bf16.mxu0 %v3534_v61  ;;  %3328 = vmatprep.subr.bf16.mxu1 %v3536_v52 }
 0x460   :  { %3309 = vmatprep.mubr.bf16.mxu0 %v4181_v15  ;;  %3350 = vmatprep.mubr.bf16.mxu1 %v4181_v15 }
 0x462   :  { %3288 = vmatpush1.bf16.msra.mxu0 %v3533_v1  ;;  %3329 = vmatpush1.bf16.msra.mxu1 %v3535_v2 }
 0x463   :  { %3289 = vmatprep.subr.bf16.mxu0 %v3526_v5  ;;  %3330 = vmatprep.subr.bf16.mxu1 %v3528_v7 }
 0x466   :  { %3290 = vmatpush1.bf16.msra.mxu0 %v3525_v26  ;;  %3331 = vmatpush1.bf16.msra.mxu1 %v3527_v27 }
 0x467   :  { %3291 = vmatprep.subr.bf16.mxu0 %v3518_v29  ;;  %3332 = vmatprep.subr.bf16.mxu1 %v3520_v33 }
 0x46a   :  { %3292 = vmatpush1.bf16.msra.mxu0 %v3517_v45  ;;  %3333 = vmatpush1.bf16.msra.mxu1 %v3519_v11 }
 0x46d   :  { %3547 = vmatmul.mubr.msk.bf16.vlgmr.msra.gmra.mxu0 %vm1219_vm2, %v2999_v60  ;;  %3548 = vmatmul.mubr.msk.bf16.vlgmr.msra.gmra.mxu1 %vm1219_vm2, %v2999_v60 }
 0x4e5   :  { %v2997_v15 = vpop.xlane.xlu0 %2996 }
 0x4e6   :  { %2998 = vst [vmem:[%s5589_s9] sm:$0x3] %v2997_v15 }
 0x51d   :  { %v3229_v19 = vpop.f32.mrf.mxu0  ;;  %v3270_v58 = vpop.f32.mrf.mxu1 }
 0x51f   :  { %v3231_v20 = vpop.f32.mrf.mxu0  ;;  %v3272_v4 = vpop.f32.mrf.mxu1 }
 0x520   :  { %v3367_v21 = vcombine.low %v3229_v19, %v3231_v20  ;;  %v3368_v24 = vcombine.low %v3270_v58, %v3272_v4 }
 0x521   :  { %v3233_v25 = vpop.f32.mrf.mxu0  ;;  %v3274_v28 = vpop.f32.mrf.mxu1 }
 0x522   :  { %v3375_v47 = vrot.slane %v3367_v21, %v3374_v17  ;;  %v3382_v30 = vrot.slane %v3368_v24, %v3374_v17 }
 0x523   :  { %v3234_v32 = vpop.f32.mrf.mxu0  ;;  %v3275_v34 = vpop.f32.mrf.mxu1 }
 0x524   :  { %v3383_v35 = vcombine.low %v3375_v47, %v3382_v30 }
 0x526   :  { %3403 = vst [vmem:[%s5590_s8] sm:$0xff] %v3383_v35 }
 0x52d   :  { %v3311_v40 = vpop.f32.mrf.mxu0  ;;  %v3352_v41 = vpop.f32.mrf.mxu1 }
 0x52f   :  { %v3313_v42 = vpop.f32.mrf.mxu0  ;;  %v3354_v48 = vpop.f32.mrf.mxu1 }
 0x530   :  { %v3384_v3 = vcombine.low %v3311_v40, %v3313_v42  ;;  %v3385_v12 = vcombine.low %v3352_v41, %v3354_v48 }
 0x531   :  { %v3315_v51 = vpop.f32.mrf.mxu0  ;;  %v3356_v31 = vpop.f32.mrf.mxu1 }
 0x532   :  { %v3392_v53 = vrot.slane %v3384_v3, %v3374_v17  ;;  %v3399_v54 = vrot.slane %v3385_v12, %v3374_v17 }
 0x533   :  { %v3316_v55 = vpop.f32.mrf.mxu0  ;;  %v3357_v57 = vpop.f32.mrf.mxu1 }
 0x534   :  { %v3400_v36 = vcombine.low %v3392_v53, %v3399_v54 }
 0x536   :  { %3404 = vst [vmem:[%s5590_s8 + $0x8] sm:$0xff] %v3400_v36 }

</bundles_post_ra>
